<compile_context>
chip_gen: v6e
topology: v6e:2x2x1
jax: 0.10.0
libtpu: 0.0.40
codegen_flags: <defaults>
</compile_context>

<pallas_src>
import jax
import jax.numpy as jnp
from jax import lax
from jax.experimental import pallas as pl
from jax.experimental.pallas import tpu as pltpu

_EPS = 1e-12  # F.normalize default eps
# ~4 MiB per-step DMA amortizes the ~0.35 us grid-step overhead even at v7x's
# ~3.2 TB/s per TC, while 4x block (in+out, double-buffered) stays well inside
# every generation's scoped VMEM budget.
_TARGET_BLOCK_BYTES = 4 << 20


# ----------------------------- kernel ---------------------------------------


def rmsnorm_kernel(x_ref, s_ref, o_ref):
    """Channel-L2 normalization on one (Nb, C, TS) tile.

    x_ref: (Nb, C, TS)  channels on sublanes, flattened spatial on lanes
    s_ref: (1,  C, 1)   per-channel scale = g * sqrt(C), f32
    o_ref: (Nb, C, TS)
    """
    x = x_ref[...].astype(jnp.float32)                 # f32 accumulation (bf16-safe)
    ss = jnp.sum(x * x, axis=1, keepdims=True)         # (Nb, 1, TS) sublane reduce
    # Identical to 1 / max(sqrt(ss), eps) but runs on the EUP (own VLIW slot)
    # instead of a multi-op VPU divide sequence.
    inv = lax.rsqrt(jnp.maximum(ss, _EPS * _EPS))
    o_ref[...] = (x * inv * s_ref[...]).astype(o_ref.dtype)


# ----------------------------- wrapper ---------------------------------------


def _choose_tiles(N, C, S_pad, itemsize, target_bytes=_TARGET_BLOCK_BYTES):
    """Byte-budget tile pick.

    Largest lane-dense TS (multiple of 128 dividing S_pad) with
    C*TS*itemsize <= target_bytes, then the largest batch block Nb dividing N
    that keeps Nb*C*TS*itemsize <= target_bytes.
    """
    ts = 128
    for d in range(128, S_pad + 1, 128):
        if S_pad % d == 0 and C * d * itemsize <= target_bytes:
            ts = d
    nb = 1
    for d in range(1, N + 1):
        if N % d == 0 and d * C * ts * itemsize <= target_bytes:
            nb = d
    return nb, ts


def rmsnorm_forward(x_ncdhw, g):
    """Pallas RMSNorm forward. x: (N, C, D, H, W); g: (1, C, 1, 1, 1)."""
    N, C, D, H, W = x_ncdhw.shape
    S = D * H * W
    x3 = x_ncdhw.reshape(N, C, S)                      # contiguous reshape: free

    # Lane-dense padding instead of a full-extent fallback block: padded lanes
    # only affect their own (discarded) output lanes.
    S_pad = ((S + 127) // 128) * 128
    if S_pad != S:
        x3 = jnp.pad(x3, ((0, 0), (0, 0), (0, S_pad - S)))

    scale = g.reshape(1, C, 1).astype(jnp.float32) * (C ** 0.5)

    itemsize = jnp.dtype(x3.dtype).itemsize
    Nb, TS = _choose_tiles(N, C, S_pad, itemsize)
    block_bytes = Nb * C * TS * itemsize
    # in + out, double-buffered, plus headroom; clamp inside every chip's budget.
    vmem_limit = int(min(max(4 * block_bytes + (2 << 20), 16 << 20), 32 << 20))

    out = pl.pallas_call(
        rmsnorm_kernel,
        out_shape=jax.ShapeDtypeStruct((N, C, S_pad), x3.dtype),
        # Spatial-tile axis leads so the (usually longer) axis carries the
        # megacore split on v7x even when N is 1 or odd.
        grid=(S_pad // TS, N // Nb),
        in_specs=[
            pl.BlockSpec((Nb, C, TS), lambda s, n: (n, 0, s)),
            pl.BlockSpec((1, C, 1), lambda s, n: (0, 0, 0)),
        ],
        out_specs=pl.BlockSpec((Nb, C, TS), lambda s, n: (n, 0, s)),
        compiler_params=pltpu.CompilerParams(
            dimension_semantics=("parallel", "parallel"),
            vmem_limit_bytes=vmem_limit),
    )(x3, scale)

    if S_pad != S:
        out = out[:, :, :S]
    return out.reshape(N, C, D, H, W)


# ----------------------------- reference -------------------------------------


def rmsnorm_reference(x, g):
    C = x.shape[1]
    xf = x.astype(jnp.float32)
    norm = jnp.sqrt(jnp.sum(xf * xf, axis=1, keepdims=True))
    return (xf / jnp.maximum(norm, _EPS) * g.astype(jnp.float32) * (C ** 0.5))


# ----------------------------- main ------------------------------------------


if __name__ == "__main__":
    key = jax.random.PRNGKey(0)
    kx, kg, kx2, kx3 = jax.random.split(key, 4)

    # NCDHW, matching the PyTorch module (3D diffusion feature maps).
    N, C, D, H, W = 2, 8, 16, 16, 16
    x = jax.random.normal(kx, (N, C, D, H, W), jnp.float32)
    # module initializes g to ones; perturb so the scale path is exercised
    g = 1.0 + 0.1 * jax.random.normal(kg, (1, C, 1, 1, 1), jnp.float32)

    out = jax.block_until_ready(rmsnorm_forward(x, g))
    ref = rmsnorm_reference(x, g)
    assert out.shape == x.shape
    assert jnp.allclose(out, ref, rtol=1e-5, atol=1e-5), "RMSNorm mismatch"

    # odd, non-128-multiple spatial shape exercises the zero-pad path
    x2 = jax.random.normal(kx2, (1, 4, 5, 6, 7), jnp.float32)
    g2 = jnp.ones((1, 4, 1, 1, 1), jnp.float32)
    out2 = jax.block_until_ready(rmsnorm_forward(x2, g2))
    assert jnp.allclose(out2, rmsnorm_reference(x2, g2), rtol=1e-5, atol=1e-5), \
        "RMSNorm (odd-shape) mismatch"

    # bf16 input exercises the f32-accumulation path while HBM traffic stays bf16
    x3 = jax.random.normal(kx3, (2, 8, 8, 8, 8), jnp.float32).astype(jnp.bfloat16)
    g3 = jnp.ones((1, 8, 1, 1, 1), jnp.float32)
    out3 = jax.block_until_ready(rmsnorm_forward(x3, g3))
    ref3 = rmsnorm_reference(x3, g3)
    assert out3.dtype == jnp.bfloat16
    assert jnp.allclose(out3.astype(jnp.float32), ref3, rtol=2e-2, atol=2e-2), \
        "RMSNorm (bf16) mismatch"

    print("KERNEL_OK")
</pallas_src>

<mosaic_0001>
module attributes {stable_mosaic.version = 11 : i64} {
  func.func @rmsnorm_kernel(%arg0: i32, %arg1: i32, %arg2: memref<2x8x4096xf32, #tpu.memory_space<vmem>>, %arg3: memref<1x8x1xf32, #tpu.memory_space<vmem>>, %arg4: memref<2x8x4096xf32, #tpu.memory_space<vmem>>) attributes {dimension_semantics = [#tpu.dimension_semantics<parallel>, #tpu.dimension_semantics<parallel>], iteration_bounds = array<i64: 1, 1>, scalar_prefetch = 0 : i64, scratch_operands = 0 : i64, tpu.core_type = #tpu.core_type<tc>, window_params = [{transform_indices = @transform_0, window_bounds = array<i64: 2, 8, 4096>}, {pipeline_mode = #tpu.pipeline_mode<synchronous>, transform_indices = @transform_1, window_bounds = array<i64: 1, 8, 1>}, {transform_indices = @transform_2, window_bounds = array<i64: 2, 8, 4096>}]} {
    %c0 = arith.constant 0 : index
    %c0_0 = arith.constant 0 : index
    %c0_1 = arith.constant 0 : index
    %0 = vector.load %arg2[%c0, %c0_0, %c0_1] : memref<2x8x4096xf32, #tpu.memory_space<vmem>>, vector<2x8x4096xf32>
    %1 = arith.mulf %0, %0 : vector<2x8x4096xf32>
    %cst = arith.constant dense<0.000000e+00> : vector<2x4096xf32>
    %2 = vector.multi_reduction <add>, %1, %cst [1] : vector<2x8x4096xf32> to vector<2x4096xf32>
    %3 = vector.shape_cast %2 : vector<2x4096xf32> to vector<2x1x4096xf32>
    %cst_2 = arith.constant 1.000000e-24 : f32
    %4 = vector.broadcast %cst_2 : f32 to vector<2x1x4096xf32>
    %5 = arith.maximumf %3, %4 : vector<2x1x4096xf32>
    %6 = math.rsqrt %5 : vector<2x1x4096xf32>
    %7 = vector.broadcast %6 : vector<2x1x4096xf32> to vector<2x8x4096xf32>
    %8 = arith.mulf %0, %7 : vector<2x8x4096xf32>
    %c0_3 = arith.constant 0 : index
    %c0_4 = arith.constant 0 : index
    %c0_5 = arith.constant 0 : index
    %9 = vector.load %arg3[%c0_3, %c0_4, %c0_5] : memref<1x8x1xf32, #tpu.memory_space<vmem>>, vector<1x8x1xf32>
    %10 = vector.broadcast %9 : vector<1x8x1xf32> to vector<2x8x4096xf32>
    %11 = arith.mulf %8, %10 : vector<2x8x4096xf32>
    %c0_6 = arith.constant 0 : index
    %c0_7 = arith.constant 0 : index
    %c0_8 = arith.constant 0 : index
    %12 = vector.load %arg4[%c0_6, %c0_7, %c0_8] : memref<2x8x4096xf32, #tpu.memory_space<vmem>>, vector<2x8x4096xf32>
    tpu.vector_store %arg4[%c0_6, %c0_7, %c0_8], %11 {strides = array<i32>} : memref<2x8x4096xf32, #tpu.memory_space<vmem>>, vector<2x8x4096xf32>,
    return
  }
  func.func @transform_0(%arg0: i32, %arg1: i32) -> (i32, i32, i32) {
    %c0_i32 = arith.constant 0 : i32
    %c0_i32_0 = arith.constant 0 : i32
    return %arg1, %c0_i32, %arg0 : i32, i32, i32
  }
  func.func @transform_1(%arg0: i32, %arg1: i32) -> (i32, i32, i32) {
    %c0_i32 = arith.constant 0 : i32
    %c0_i32_0 = arith.constant 0 : i32
    %c0_i32_1 = arith.constant 0 : i32
    %c0_i32_2 = arith.constant 0 : i32
    return %c0_i32, %c0_i32_0, %c0_i32_1 : i32, i32, i32
  }
  func.func @transform_2(%arg0: i32, %arg1: i32) -> (i32, i32, i32) {
    %c0_i32 = arith.constant 0 : i32
    %c0_i32_0 = arith.constant 0 : i32
    return %arg1, %c0_i32, %arg0 : i32, i32, i32
  }
}

</mosaic_0001>

<bundles_post_ra>
// kernel: tpu_custom_call.1
= control target key start
LH: loop header
LB: loop body
LE: loop exit
PB: predicated region body
PF: predicated region fallthrough
CT: control target
= control target key end

     0   :  { %7 = vsyncpa [#allocation3], 0  ;;  %s1664_s0 = inlined_call_operand.hbm [shape: f32[2,8,4096], index: 0, kind: input, shape index: {}]   ;;  %s1665_s1 = inlined_call_operand.vmem [shape: f32[1,8,1], index: 1, kind: input, shape index: {}]   ;;  %s1666_s2 = inlined_call_operand.hbm [shape: f32[2,8,4096], index: 2, kind: output, shape index: {}]  }
   0x1   :  { %8 = vsyncpa [#allocation4], 0  ;;  %s1123_s9 = smov [#allocation2]  }
   0x2   :  { %s14_s10 = sshll.u32 %s1123_s9, 4  ;;  %s15_s10 = int_to_ptr.vmem [resolvable:$true] %s14_s10 }
   0x3   :  { %s1087_s11 = scalar_lea.vmem %s15_s10, 8192  ;;  %p1092_p1 = scmp.lt.s32.totalorder %s15_s10, %s15_s10 }
   0x4   :  { %p1088_p0 = scmp.ne.s32.totalorder %s15_s10, %s1087_s11  ;;  %p1093_p2 = scmp.lt.s32.totalorder %s1087_s11, %s1087_s11 }
   0x6   :  { %p1094_p3 = por %p1093_p2, %p1092_p1 }
   0x8   :  { %p1095_p4 = pnand %p1094_p3, %p1088_p0 }
   0xa   :  { %1098 = shalt.err (!%p1095_p4)
}
   0xb   :  { %s1124_s12 = smov 4096   ;;  %s1125_s13 = smov 256  }
   0xc   :  { %20 = dma.hbm_to_vmem [thread:$0]  %s1664_s0, 8192, %s15_s10, [#allocation3], %s1124_s12, %s1124_s12, %s1125_s13  }
   0xd   :  { %1119 = dma.done.wait [#allocation3], 8192  }
   0xe   :  { %1120 = vsyncadd [#allocation3], 4294959104  ;;  %v1126_v0 = vmov 0   ;;  %v730_v1 = vld [vmem:[%s1665_s1] sm:$0xff]  ;;  %v27_v3 = vld [vmem:[#allocation2 + $0x8] sm:$0xff]  ;;  %s1127_s0 = smov [#allocation5]  }
   0xf   :  { %886 = vset.pattern.permute.xlu0 %v1126_v0  ;;  %v26_v2 = vld [vmem:[#allocation2] sm:$0xff]  ;;  %v91_v5 = vmul.f32 %v27_v3, %v27_v3  ;;  %v28_v9 = vld [vmem:[#allocation2 + $0x10] sm:$0xff]  ;;  %v29_v10 = vld [vmem:[#allocation2 + $0x18] sm:$0xff]  ;;  %s869_s1 = sshll.u32 %s1127_s0, 4  ;;  %s870_s1 = int_to_ptr.vmem [resolvable:$true] %s869_s1 }
  0x10   :  { %733 = vperm.xlu0 %886, %v730_v1   ;;  %v90_v4 = vmul.f32 %v26_v2, %v26_v2  ;;  %v30_v12 = vld [vmem:[#allocation2 + $0x20] sm:$0xff]  ;;  %v31_v13 = vld [vmem:[#allocation2 + $0x28] sm:$0xff]  ;;  %v32_v14 = vld [vmem:[#allocation2 + $0x30] sm:$0xff]  ;;  %v1152_v25 = vmul.f32 %v28_v9, %v28_v9  ;;  %v1154_v26 = vmul.f32 %v29_v10, %v29_v10  ;;  %s1099_s18 = scalar_lea.vmem %s870_s1, 8192  ;;  %p1104_p6 = scmp.lt.s32.totalorder %s870_s1, %s870_s1 }
  0x11   :  { %v160_v7 = vrot.slane %v91_v5, 4  ;;  %v33_v15 = vld [vmem:[#allocation2 + $0x38] sm:$0xff]  ;;  %v34_v16 = vld [vmem:[#allocation2 + $0x40] sm:$0xff]  ;;  %v35_v17 = vld [vmem:[#allocation2 + $0x48] sm:$0xff]  ;;  %v1156_v31 = vmul.f32 %v30_v12, %v30_v12  ;;  %v1158_v32 = vmul.f32 %v31_v13, %v31_v13  ;;  %v1160_v33 = vmul.f32 %v32_v14, %v32_v14  ;;  %p1100_p5 = scmp.ne.s32.totalorder %s870_s1, %s1099_s18  ;;  %p1105_p7 = scmp.lt.s32.totalorder %s1099_s18, %s1099_s18 }
  0x12   :  { %v154_v6 = vrot.slane %v90_v4, 4  ;;  %v36_v18 = vld [vmem:[#allocation2 + $0x50] sm:$0xff]  ;;  %v37_v19 = vld [vmem:[#allocation2 + $0x58] sm:$0xff]  ;;  %v38_v20 = vld [vmem:[#allocation2 + $0x60] sm:$0xff]  ;;  %v1162_v34 = vmul.f32 %v33_v15, %v33_v15  ;;  %v1164_v38 = vmul.f32 %v34_v16, %v34_v16  ;;  %v1166_v39 = vmul.f32 %v35_v17, %v35_v17 }
  0x13   :  { %v161_v11 = vadd.f32 %v160_v7, %v91_v5  ;;  %v39_v22 = vld [vmem:[#allocation2 + $0x68] sm:$0xff]  ;;  %v40_v23 = vld [vmem:[#allocation2 + $0x70] sm:$0xff]  ;;  %v41_v24 = vld [vmem:[#allocation2 + $0x78] sm:$0xff]  ;;  %v1168_v40 = vmul.f32 %v36_v18, %v36_v18  ;;  %v1170_v41 = vmul.f32 %v37_v19, %v37_v19  ;;  %v1172_v45 = vmul.f32 %v38_v20, %v38_v20  ;;  %p1106_p8 = por %p1105_p7, %p1104_p6 }
  0x14   :  { %v155_v8 = vadd.f32 %v154_v6, %v90_v4  ;;  %v42_v28 = vld [vmem:[#allocation2 + $0x80] sm:$0xff]  ;;  %v43_v29 = vld [vmem:[#allocation2 + $0x88] sm:$0xff]  ;;  %v44_v30 = vld [vmem:[#allocation2 + $0x90] sm:$0xff]  ;;  %v1174_v46 = vmul.f32 %v39_v22, %v39_v22  ;;  %v1176_v47 = vmul.f32 %v40_v23, %v40_v23  ;;  %v1178_v52 = vmul.f32 %v41_v24, %v41_v24 }
  0x15   :  { %v162_v27 = vrot.slane %v161_v11, 2  ;;  %v45_v35 = vld [vmem:[#allocation2 + $0x98] sm:$0xff]  ;;  %v46_v36 = vld [vmem:[#allocation2 + $0xa0] sm:$0xff]  ;;  %v47_v37 = vld [vmem:[#allocation2 + $0xa8] sm:$0xff]  ;;  %v1180_v53 = vmul.f32 %v42_v28, %v42_v28  ;;  %v1182_v54 = vmul.f32 %v43_v29, %v43_v29  ;;  %v1184_v59 = vmul.f32 %v44_v30, %v44_v30  ;;  %p1107_p9 = pnand %p1106_p8, %p1100_p5 }
  0x16   :  { %v156_v21 = vrot.slane %v155_v8, 2  ;;  %v48_v42 = vld [vmem:[#allocation2 + $0xb0] sm:$0xff]  ;;  %v49_v43 = vld [vmem:[#allocation2 + $0xb8] sm:$0xff]  ;;  %v50_v44 = vld [vmem:[#allocation2 + $0xc0] sm:$0xff]  ;;  %v1186_v60 = vmul.f32 %v45_v35, %v45_v35  ;;  %v1188_v61 = vmul.f32 %v46_v36, %v46_v36  ;;  %v1190_v62 = vmul.f32 %v47_v37, %v47_v37 }
  0x17   :  { %v51_v49 = vld [vmem:[#allocation2 + $0xc8] sm:$0xff]  ;;  %v52_v50 = vld [vmem:[#allocation2 + $0xd0] sm:$0xff]  ;;  %v53_v51 = vld [vmem:[#allocation2 + $0xd8] sm:$0xff]  ;;  %v163_v55 = vadd.f32 %v162_v27, %v161_v11  ;;  %v1192_v2 = vmul.f32 %v48_v42, %v48_v42  ;;  %v1194_v3 = vmul.f32 %v49_v43, %v49_v43  ;;  %v1196_v4 = vmul.f32 %v50_v44, %v50_v44 }
  0x18   :  { %v157_v48 = vadd.f32 %v156_v21, %v155_v8  ;;  %v54_v56 = vld [vmem:[#allocation2 + $0xe0] sm:$0xff]  ;;  %v55_v57 = vld [vmem:[#allocation2 + $0xe8] sm:$0xff]  ;;  %v56_v58 = vld [vmem:[#allocation2 + $0xf0] sm:$0xff]  ;;  %v166_v5 = vrot.slane %v1152_v25, 4  ;;  %v1199_v9 = vmul.f32 %v51_v49, %v51_v49  ;;  %v1201_v10 = vmul.f32 %v52_v50, %v52_v50 }
  0x19   :  { %v57_v63 = vld [vmem:[#allocation2 + $0xf8] sm:$0xff]  ;;  %v58_v0 = vld [vmem:[#allocation2 + $0x100] sm:$0xff]  ;;  %v59_v1 = vld [vmem:[#allocation2 + $0x108] sm:$0xff]  ;;  %v172_v12 = vrot.slane %v1154_v26, 4  ;;  %v1204_v14 = vmul.f32 %v53_v51, %v53_v51  ;;  %v1206_v15 = vmul.f32 %v54_v56, %v54_v56  ;;  %v1208_v16 = vmul.f32 %v55_v57, %v55_v57 }
  0x1a   :  { %v60_v6 = vld [vmem:[#allocation2 + $0x110] sm:$0xff]  ;;  %v61_v7 = vld [vmem:[#allocation2 + $0x118] sm:$0xff]  ;;  %v62_v8 = vld [vmem:[#allocation2 + $0x120] sm:$0xff]  ;;  %v158_v11 = vrot.slane %v157_v48, 1  ;;  %v164_v17 = vrot.slane %v163_v55, 1  ;;  %v1210_v21 = vmul.f32 %v56_v58, %v56_v58  ;;  %v1212_v22 = vmul.f32 %v57_v63, %v57_v63 }
  0x1b   :  { %v63_v13 = vld [vmem:[#allocation2 + $0x128] sm:$0xff]  ;;  %v64_v18 = vld [vmem:[#allocation2 + $0x130] sm:$0xff]  ;;  %v65_v19 = vld [vmem:[#allocation2 + $0x138] sm:$0xff]  ;;  %v1214_v23 = vmul.f32 %v58_v0, %v58_v0  ;;  %v1216_v24 = vmul.f32 %v59_v1, %v59_v1  ;;  %v1218_v30 = vmul.f32 %v60_v6, %v60_v6  ;;  %v1220_v35 = vmul.f32 %v61_v7, %v61_v7 }
  0x1c   :  { %v66_v20 = vld [vmem:[#allocation2 + $0x140] sm:$0xff]  ;;  %v67_v27 = vld [vmem:[#allocation2 + $0x148] sm:$0xff]  ;;  %v68_v28 = vld [vmem:[#allocation2 + $0x150] sm:$0xff]  ;;  %v1222_v36 = vmul.f32 %v62_v8, %v62_v8  ;;  %v167_v37 = vadd.f32 %v166_v5, %v1152_v25  ;;  %v1225_v44 = vmul.f32 %v63_v13, %v63_v13  ;;  %v1227_v49 = vadd.f32 %v158_v11, %v157_v48 }
  0x1d   :  { %v69_v29 = vld [vmem:[#allocation2 + $0x158] sm:$0xff]  ;;  %v70_v42 = vld [vmem:[#allocation2 + $0x160] sm:$0xff]  ;;  %v71_v43 = vld [vmem:[#allocation2 + $0x168] sm:$0xff]  ;;  %v173_v50 = vadd.f32 %v172_v12, %v1154_v26  ;;  %v178_v51 = vrot.slane %v1156_v31, 4  ;;  %v1231_v57 = vmul.f32 %v64_v18, %v64_v18  ;;  %v1233_v58 = vmul.f32 %v65_v19, %v65_v19 }
  0x1e   :  { %1688 = vst [vmem:[#allocation8_spill] sm:$0xff] %v1227_v49  ;;  %v72_v56 = vld [vmem:[#allocation2 + $0x170] sm:$0xff]  ;;  %v1235_v63 = vmul.f32 %v66_v20, %v66_v20  ;;  %v1237_v0 = vadd.f32 %v164_v17, %v163_v55  ;;  %v73_v25 = vld [vmem:[#allocation2 + $0x178] sm:$0xff]  ;;  %v74_v1 = vld [vmem:[#allocation2 + $0x180] sm:$0xff]  ;;  %v1239_v5 = vmul.f32 %v67_v27, %v67_v27  ;;  %v1241_v6 = vmul.f32 %v68_v28, %v68_v28 }
  0x1f   :  { %1689 = vst [vmem:[#allocation9_spill] sm:$0xff] %v1231_v57  ;;  %1690 = vst [vmem:[#allocation10_spill] sm:$0xff] %v1233_v58  ;;  %v1243_v48 = vmul.f32 %v69_v29, %v69_v29  ;;  %v184_v26 = vrot.slane %v1158_v32, 4  ;;  %v75_v7 = vld [vmem:[#allocation2 + $0x188] sm:$0xff]  ;;  %v76_v8 = vld [vmem:[#allocation2 + $0x190] sm:$0xff]  ;;  %v1246_v12 = vmul.f32 %v70_v42, %v70_v42  ;;  %v1248_v13 = vmul.f32 %v71_v43, %v71_v43 }
  0x20   :  { %1691 = vst [vmem:[#allocation11_spill] sm:$0xff] %v1235_v63  ;;  %1692 = vst [vmem:[#allocation12_spill] sm:$0xff] %v1237_v0  ;;  %v77_v11 = vld [vmem:[#allocation2 + $0x198] sm:$0xff]  ;;  %v168_v18 = vrot.slane %v167_v37, 2  ;;  %v190_v55 = vrot.slane %v1160_v33, 4  ;;  %v78_v17 = vld [vmem:[#allocation2 + $0x1a0] sm:$0xff]  ;;  %v1251_v20 = vmul.f32 %v72_v56, %v72_v56  ;;  %v179_v28 = vadd.f32 %v178_v51, %v1156_v31 }
  0x21   :  { %1693 = vst [vmem:[#allocation13_spill] sm:$0xff] %v1239_v5  ;;  %1694 = vst [vmem:[#allocation14_spill] sm:$0xff] %v1241_v6  ;;  %v79_v19 = vld [vmem:[#allocation2 + $0x1a8] sm:$0xff]  ;;  %v174_v27 = vrot.slane %v173_v50, 2  ;;  %v196_v29 = vrot.slane %v1162_v34, 4  ;;  %v80_v0 = vld [vmem:[#allocation2 + $0x1b0] sm:$0xff]  ;;  %v1255_v49 = vmul.f32 %v73_v25, %v73_v25  ;;  %v1261_v6 = vmul.f32 %v75_v7, %v75_v7 }
  0x22   :  { %1695 = vst [vmem:[#allocation15_spill] sm:$0xff] %v1243_v48  ;;  %1696 = vst [vmem:[#allocation16_spill] sm:$0xff] %v1246_v12  ;;  %v1257_v48 = vmul.f32 %v74_v1, %v74_v1  ;;  %v202_v42 = vrot.slane %v1164_v38, 4  ;;  %v208_v43 = vrot.slane %v1166_v39, 4  ;;  %v82_v12 = vld [vmem:[#allocation2 + $0x1c0] sm:$0xff]  ;;  %v1263_v56 = vmul.f32 %v76_v8, %v76_v8  ;;  %v83_v51 = vld [vmem:[#allocation2 + $0x1c8] sm:$0xff] }
  0x23   :  { %1697 = vst [vmem:[#allocation17_spill] sm:$0xff] %v1248_v13  ;;  %1698 = vst [vmem:[#allocation18_spill] sm:$0xff] %v1251_v20  ;;  %v81_v13 = vld [vmem:[#allocation2 + $0x1b8] sm:$0xff]  ;;  %v1265_v20 = vmul.f32 %v77_v11, %v77_v11  ;;  %v185_v31 = vadd.f32 %v184_v26, %v1158_v32  ;;  %v84_v5 = vld [vmem:[#allocation2 + $0x1d0] sm:$0xff]  ;;  %v1270_v1 = vmul.f32 %v79_v19, %v79_v19 }
  0x24   :  { %1699 = vst [vmem:[#allocation19_spill] sm:$0xff] %v1255_v49  ;;  %1700 = vst [vmem:[#allocation20_spill] sm:$0xff] %v1257_v48  ;;  %v85_v25 = vld [vmem:[#allocation2 + $0x1d8] sm:$0xff]  ;;  %v1268_v49 = vmul.f32 %v78_v17, %v78_v17  ;;  %v169_v48 = vadd.f32 %v168_v18, %v167_v37  ;;  %v191_v63 = vadd.f32 %v190_v55, %v1160_v33  ;;  %v86_v58 = vld [vmem:[#allocation2 + $0x1e0] sm:$0xff] }
  0x25   :  { %1701 = vst [vmem:[#allocation21_spill] sm:$0xff] %v1263_v56  ;;  %1702 = vst [vmem:[#allocation22_spill] sm:$0xff] %v1265_v20  ;;  %v87_v57 = vld [vmem:[#allocation2 + $0x1e8] sm:$0xff]  ;;  %v1273_v7 = vmul.f32 %v80_v0, %v80_v0  ;;  %v175_v8 = vadd.f32 %v174_v27, %v173_v50  ;;  %v180_v56 = vrot.slane %v179_v28, 2  ;;  %v197_v11 = vadd.f32 %v196_v29, %v1162_v34  ;;  %v88_v19 = vld [vmem:[#allocation2 + $0x1f0] sm:$0xff] }
  0x26   :  { %v1276_v20 = vmul.f32 %v81_v13, %v81_v13  ;;  %v1278_v32 = vmul.f32 %v82_v12, %v82_v12  ;;  %v203_v26 = vadd.f32 %v202_v42, %v1164_v38  ;;  %v209_v17 = vadd.f32 %v208_v43, %v1166_v39  ;;  %v89_v50 = vld [vmem:[#allocation2 + $0x1f8] sm:$0xff] }
  0x27   :  { %v1282_v37 = vmul.f32 %v83_v51, %v83_v51  ;;  %v1284_v33 = vmul.f32 %v84_v5, %v84_v5  ;;  %v1286_v18 = vmul.f32 %v85_v25, %v85_v25  ;;  %v186_v0 = vrot.slane %v185_v31, 2 }
  0x28   :  { %1703 = vst [vmem:[#allocation23_spill] sm:$0xff] %v1278_v32  ;;  %v1288_v55 = vmul.f32 %v86_v58, %v86_v58  ;;  %v1290_v34 = vmul.f32 %v87_v57, %v87_v57  ;;  %v170_v13 = vrot.slane %v169_v48, 1  ;;  %v192_v12 = vrot.slane %v191_v63, 2 }
  0x29   :  { %1704 = vst [vmem:[#allocation24_spill] sm:$0xff] %v1282_v37  ;;  %1705 = vst [vmem:[#allocation25_spill] sm:$0xff] %v1284_v33  ;;  %v176_v27 = vrot.slane %v175_v8, 1  ;;  %v181_v29 = vadd.f32 %v180_v56, %v179_v28  ;;  %v198_v38 = vrot.slane %v197_v11, 2  ;;  %v214_v39 = vrot.slane %v1168_v40, 4 }
  0x2a   :  { %1706 = vst [vmem:[#allocation26_spill] sm:$0xff] %v1286_v18  ;;  %1707 = vst [vmem:[#allocation27_spill] sm:$0xff] %v1288_v55  ;;  %v1293_v42 = vmul.f32 %v88_v19, %v88_v19  ;;  %v204_v43 = vrot.slane %v203_v26, 2  ;;  %v210_v5 = vrot.slane %v209_v17, 2  ;;  %v220_v51 = vrot.slane %v1170_v41, 4 }
  0x2b   :  { %1708 = vst [vmem:[#allocation28_spill] sm:$0xff] %v1290_v34  ;;  %v1296_v25 = vmul.f32 %v89_v50, %v89_v50  ;;  %v187_v18 = vadd.f32 %v186_v0, %v185_v31  ;;  %v226_v58 = vrot.slane %v1172_v45, 4  ;;  %v232_v57 = vrot.slane %v1174_v46, 4 }
  0x2c   :  { %1709 = vst [vmem:[#allocation29_spill] sm:$0xff] %v1293_v42  ;;  %v1300_v34 = vadd.f32 %v170_v13, %v169_v48  ;;  %v193_v55 = vadd.f32 %v192_v12, %v191_v63  ;;  %v238_v28 = vrot.slane %v1176_v47, 4  ;;  %v244_v56 = vrot.slane %v1178_v52, 4 }
  0x2d   :  { %1710 = vst [vmem:[#allocation30_spill] sm:$0xff] %v1296_v25  ;;  %v1304_v19 = vadd.f32 %v176_v27, %v175_v8  ;;  %v182_v42 = vrot.slane %v181_v29, 1  ;;  %v199_v33 = vadd.f32 %v198_v38, %v197_v11  ;;  %v215_v37 = vadd.f32 %v214_v39, %v1168_v40 }
  0x2e   :  { %v205_v50 = vadd.f32 %v204_v43, %v203_v26  ;;  %v211_v25 = vadd.f32 %v210_v5, %v209_v17  ;;  %v221_v31 = vadd.f32 %v220_v51, %v1170_v41  ;;  %v250_v0 = vrot.slane %v1180_v53, 4 }
  0x2f   :  { %v188_v32 = vrot.slane %v187_v18, 1  ;;  %v227_v48 = vadd.f32 %v226_v58, %v1172_v45  ;;  %v233_v63 = vadd.f32 %v232_v57, %v1174_v46  ;;  %v256_v13 = vrot.slane %v1182_v54, 4 }
  0x30   :  { %v194_v12 = vrot.slane %v193_v55, 1  ;;  %v239_v8 = vadd.f32 %v238_v28, %v1176_v47  ;;  %v245_v11 = vadd.f32 %v244_v56, %v1178_v52  ;;  %v262_v40 = vrot.slane %v1184_v59, 4 }
  0x31   :  { %v1315_v26 = vadd.f32 %v182_v42, %v181_v29  ;;  %v200_v17 = vrot.slane %v199_v33, 1  ;;  %v216_v41 = vrot.slane %v215_v37, 2  ;;  %v268_v27 = vrot.slane %v1186_v60, 4 }
  0x32   :  { %v206_v38 = vrot.slane %v205_v50, 1  ;;  %v212_v39 = vrot.slane %v211_v25, 1  ;;  %v222_v45 = vrot.slane %v221_v31, 2  ;;  %v251_v46 = vadd.f32 %v250_v0, %v1180_v53 }
  0x33   :  { %1711 = vst [vmem:[#allocation31_spill] sm:$0xff] %v1315_v26  ;;  %v1319_v43 = vadd.f32 %v188_v32, %v187_v18  ;;  %v228_v5 = vrot.slane %v227_v48, 2  ;;  %v234_v51 = vrot.slane %v233_v63, 2  ;;  %v257_v47 = vadd.f32 %v256_v13, %v1182_v54 }
  0x34   :  { %v1322_v52 = vadd.f32 %v194_v12, %v193_v55  ;;  %v240_v58 = vrot.slane %v239_v8, 2  ;;  %v246_v29 = vrot.slane %v245_v11, 2  ;;  %v263_v42 = vadd.f32 %v262_v40, %v1184_v59 }
  0x35   :  { %v1325_v57 = vadd.f32 %v200_v17, %v199_v33  ;;  %v217_v28 = vadd.f32 %v216_v41, %v215_v37  ;;  %v269_v56 = vadd.f32 %v268_v27, %v1186_v60  ;;  %v274_v26 = vrot.slane %v1188_v61, 4 }
  0x36   :  { %1712 = vst [vmem:[#allocation32_spill] sm:$0xff] %v1322_v52  ;;  %v1329_v53 = vadd.f32 %v206_v38, %v205_v50  ;;  %v1331_v32 = vadd.f32 %v212_v39, %v211_v25  ;;  %v223_v18 = vadd.f32 %v222_v45, %v221_v31  ;;  %v252_v0 = vrot.slane %v251_v46, 2 }
  0x37   :  { %v229_v54 = vadd.f32 %v228_v5, %v227_v48  ;;  %v235_v55 = vadd.f32 %v234_v51, %v233_v63  ;;  %v258_v13 = vrot.slane %v257_v47, 2  ;;  %v280_v12 = vrot.slane %v1190_v62, 4 }
  0x38   :  { %v241_v52 = vadd.f32 %v240_v58, %v239_v8  ;;  %v247_v59 = vadd.f32 %v246_v29, %v245_v11  ;;  %v264_v33 = vrot.slane %v263_v42, 2  ;;  %v286_v37 = vrot.slane %v1192_v2, 4 }
  0x39   :  { %v218_v40 = vrot.slane %v217_v28, 1  ;;  %v270_v60 = vrot.slane %v269_v56, 2  ;;  %v275_v17 = vadd.f32 %v274_v26, %v1188_v61  ;;  %v292_v50 = vrot.slane %v1194_v3, 4 }
  0x3a   :  { %v224_v25 = vrot.slane %v223_v18, 1  ;;  %v253_v41 = vadd.f32 %v252_v0, %v251_v46  ;;  %v298_v31 = vrot.slane %v1196_v4, 4  ;;  %v304_v48 = vrot.slane %v1199_v9, 4 }
  0x3b   :  { %v230_v63 = vrot.slane %v229_v54, 1  ;;  %v236_v27 = vrot.slane %v235_v55, 1  ;;  %v259_v38 = vadd.f32 %v258_v13, %v257_v47  ;;  %v281_v8 = vadd.f32 %v280_v12, %v1190_v62 }
  0x3c   :  { %v242_v11 = vrot.slane %v241_v52, 1  ;;  %v248_v39 = vrot.slane %v247_v59, 1  ;;  %v265_v45 = vadd.f32 %v264_v33, %v263_v42  ;;  %v287_v5 = vadd.f32 %v286_v37, %v1192_v2 }
  0x3d   :  { %v1341_v51 = vadd.f32 %v218_v40, %v217_v28  ;;  %v271_v61 = vadd.f32 %v270_v60, %v269_v56  ;;  %v276_v26 = vrot.slane %v275_v17, 2  ;;  %v293_v46 = vadd.f32 %v292_v50, %v1194_v3 }
  0x3e   :  { %v1344_v58 = vadd.f32 %v224_v25, %v223_v18  ;;  %v254_v29 = vrot.slane %v253_v41, 1  ;;  %v299_v0 = vadd.f32 %v298_v31, %v1196_v4  ;;  %v305_v47 = vadd.f32 %v304_v48, %v1199_v9 }
  0x3f   :  { %v1348_v13 = vadd.f32 %v230_v63, %v229_v54  ;;  %v1350_v62 = vadd.f32 %v236_v27, %v235_v55  ;;  %v260_v42 = vrot.slane %v259_v38, 1  ;;  %v282_v12 = vrot.slane %v281_v8, 2 }
  0x40   :  { %v1352_v2 = vadd.f32 %v242_v11, %v241_v52  ;;  %v1354_v28 = vadd.f32 %v248_v39, %v247_v59  ;;  %v266_v56 = vrot.slane %v265_v45, 1  ;;  %v288_v33 = vrot.slane %v287_v5, 2 }
  0x41   :  { %v272_v3 = vrot.slane %v271_v61, 1  ;;  %v277_v18 = vadd.f32 %v276_v26, %v275_v17  ;;  %v294_v37 = vrot.slane %v293_v46, 2  ;;  %v310_v40 = vrot.slane %v1201_v10, 4 }
  0x42   :  { %v1357_v4 = vadd.f32 %v254_v29, %v253_v41  ;;  %v300_v9 = vrot.slane %v299_v0, 2  ;;  %v306_v54 = vrot.slane %v305_v47, 2  ;;  %v316_v55 = vrot.slane %v1204_v14, 4 }
  0x43   :  { %v1360_v60 = vadd.f32 %v260_v42, %v259_v38  ;;  %v283_v50 = vadd.f32 %v282_v12, %v281_v8  ;;  %v322_v52 = vrot.slane %v1206_v15, 4  ;;  %v328_v59 = vrot.slane %v1208_v16, 4 }
  0x44   :  { %v1364_v25 = vadd.f32 %v266_v56, %v265_v45  ;;  %v289_v31 = vadd.f32 %v288_v33, %v287_v5  ;;  %v334_v17 = vrot.slane %v1210_v21, 4  ;;  %v340_v48 = vrot.slane %v1212_v22, 4 }
  0x45   :  { %v1368_v41 = vadd.f32 %v272_v3, %v271_v61  ;;  %v278_v63 = vrot.slane %v277_v18, 1  ;;  %v295_v27 = vadd.f32 %v294_v37, %v293_v46  ;;  %v311_v11 = vadd.f32 %v310_v40, %v1201_v10 }
  0x46   :  { %v301_v38 = vadd.f32 %v300_v9, %v299_v0  ;;  %v307_v39 = vadd.f32 %v306_v54, %v305_v47  ;;  %v317_v8 = vadd.f32 %v316_v55, %v1204_v14  ;;  %v346_v26 = vrot.slane %v1214_v23, 4 }
  0x47   :  { %v284_v29 = vrot.slane %v283_v50, 1  ;;  %v323_v45 = vadd.f32 %v322_v52, %v1206_v15  ;;  %v329_v5 = vadd.f32 %v328_v59, %v1208_v16  ;;  %v352_v42 = vrot.slane %v1216_v24, 4 }
  0x48   :  { %v290_v12 = vrot.slane %v289_v31, 1  ;;  %v335_v61 = vadd.f32 %v334_v17, %v1210_v21  ;;  %v341_v46 = vadd.f32 %v340_v48, %v1212_v22  ;;  %v358_v10 = vrot.slane %v1218_v30, 4 }
  0x49   :  { %v1379_v0 = vadd.f32 %v278_v63, %v277_v18  ;;  %v296_v47 = vrot.slane %v295_v27, 1  ;;  %v312_v14 = vrot.slane %v311_v11, 2  ;;  %v364_v56 = vrot.slane %v1220_v35, 4 }
  0x4a   :  { %v302_v33 = vrot.slane %v301_v38, 1  ;;  %v308_v3 = vrot.slane %v307_v39, 1  ;;  %v318_v15 = vrot.slane %v317_v8, 2  ;;  %v347_v16 = vadd.f32 %v346_v26, %v1214_v23 }
  0x4b   :  { %v1383_v37 = vadd.f32 %v284_v29, %v283_v50  ;;  %v324_v40 = vrot.slane %v323_v45, 2  ;;  %v330_v9 = vrot.slane %v329_v5, 2  ;;  %v353_v21 = vadd.f32 %v352_v42, %v1216_v24 }
  0x4c   :  { %v1386_v22 = vadd.f32 %v290_v12, %v289_v31  ;;  %v336_v54 = vrot.slane %v335_v61, 2  ;;  %v342_v18 = vrot.slane %v341_v46, 2  ;;  %v359_v55 = vadd.f32 %v358_v10, %v1218_v30  ;;  %v1717_v10 = vld [vmem:[#allocation9_spill] sm:$0xff] }
  0x4d   :  { %v1389_v52 = vadd.f32 %v296_v47, %v295_v27  ;;  %v313_v59 = vadd.f32 %v312_v14, %v311_v11  ;;  %v365_v17 = vadd.f32 %v364_v56, %v1220_v35  ;;  %v370_v48 = vrot.slane %v1222_v36, 4 }
  0x4e   :  { %1713 = vst [vmem:[#allocation33_spill] sm:$0xff] %v1386_v22  ;;  %v1393_v23 = vadd.f32 %v302_v33, %v301_v38  ;;  %v1395_v50 = vadd.f32 %v308_v3, %v307_v39  ;;  %v319_v63 = vadd.f32 %v318_v15, %v317_v8  ;;  %v348_v26 = vrot.slane %v347_v16, 2  ;;  %v1718_v38 = vld [vmem:[#allocation10_spill] sm:$0xff]  ;;  %v1719_v8 = vld [vmem:[#allocation11_spill] sm:$0xff] }
  0x4f   :  { %1714 = vst [vmem:[#allocation34_spill] sm:$0xff] %v1389_v52  ;;  %v325_v24 = vadd.f32 %v324_v40, %v323_v45  ;;  %v331_v31 = vadd.f32 %v330_v9, %v329_v5  ;;  %v354_v29 = vrot.slane %v353_v21, 2  ;;  %v376_v42 = vrot.slane %v1225_v44, 4  ;;  %v1720_v45 = vld [vmem:[#allocation13_spill] sm:$0xff] }
  0x50   :  { %1715 = vst [vmem:[#allocation35_spill] sm:$0xff] %v1393_v23  ;;  %1716 = vst [vmem:[#allocation36_spill] sm:$0xff] %v1395_v50  ;;  %v337_v12 = vadd.f32 %v336_v54, %v335_v61  ;;  %v343_v30 = vadd.f32 %v342_v18, %v341_v46  ;;  %v360_v27 = vrot.slane %v359_v55, 2  ;;  %v382_v11 = vrot.slane %v1717_v10, 4 }
  0x51   :  { %v314_v47 = vrot.slane %v313_v59, 1  ;;  %v366_v35 = vrot.slane %v365_v17, 2  ;;  %v371_v14 = vadd.f32 %v370_v48, %v1222_v36  ;;  %v388_v56 = vrot.slane %v1718_v38, 4 }
  0x52   :  { %v320_v39 = vrot.slane %v319_v63, 1  ;;  %v349_v33 = vadd.f32 %v348_v26, %v347_v16  ;;  %v394_v3 = vrot.slane %v1719_v8, 4  ;;  %v400_v5 = vrot.slane %v1720_v45, 4 }
  0x53   :  { %v326_v15 = vrot.slane %v325_v24, 1  ;;  %v332_v40 = vrot.slane %v331_v31, 1  ;;  %v355_v9 = vadd.f32 %v354_v29, %v353_v21  ;;  %v377_v61 = vadd.f32 %v376_v42, %v1225_v44 }
  0x54   :  { %v338_v46 = vrot.slane %v337_v12, 1  ;;  %v344_v54 = vrot.slane %v343_v30, 1  ;;  %v361_v18 = vadd.f32 %v360_v27, %v359_v55  ;;  %v383_v50 = vadd.f32 %v382_v11, %v1717_v10 }
  0x55   :  { %v1405_v23 = vadd.f32 %v314_v47, %v313_v59  ;;  %v367_v36 = vadd.f32 %v366_v35, %v365_v17  ;;  %v372_v48 = vrot.slane %v371_v14, 2  ;;  %v389_v16 = vadd.f32 %v388_v56, %v1718_v38  ;;  %v1724_v35 = vld [vmem:[#allocation14_spill] sm:$0xff] }
  0x56   :  { %v1408_v26 = vadd.f32 %v320_v39, %v319_v63  ;;  %v350_v52 = vrot.slane %v349_v33, 1  ;;  %v395_v22 = vadd.f32 %v394_v3, %v1719_v8  ;;  %v401_v21 = vadd.f32 %v400_v5, %v1720_v45  ;;  %v1726_v8 = vld [vmem:[#allocation15_spill] sm:$0xff] }
  0x57   :  { %v1412_v29 = vadd.f32 %v326_v15, %v325_v24  ;;  %v1414_v44 = vadd.f32 %v332_v40, %v331_v31  ;;  %v356_v55 = vrot.slane %v355_v9, 1  ;;  %v378_v42 = vrot.slane %v377_v61, 2 }
  0x58   :  { %v1416_v27 = vadd.f32 %v338_v46, %v337_v12  ;;  %v1418_v59 = vadd.f32 %v344_v54, %v343_v30  ;;  %v362_v17 = vrot.slane %v361_v18, 1  ;;  %v384_v10 = vrot.slane %v383_v50, 2  ;;  %v1728_v12 = vld [vmem:[#allocation16_spill] sm:$0xff]  ;;  %v1729_v30 = vld [vmem:[#allocation17_spill] sm:$0xff] }
  0x59   :  { %1721 = vst [vmem:[#allocation9_spill] sm:$0xff] %v1414_v44  ;;  %v368_v11 = vrot.slane %v367_v36, 1  ;;  %v373_v63 = vadd.f32 %v372_v48, %v371_v14  ;;  %v390_v47 = vrot.slane %v389_v16, 2  ;;  %v406_v38 = vrot.slane %v1724_v35, 4  ;;  %v1731_v14 = vld [vmem:[#allocation18_spill] sm:$0xff]  ;;  %v1732_v48 = vld [vmem:[#allocation19_spill] sm:$0xff] }
  0x5a   :  { %1722 = vst [vmem:[#allocation10_spill] sm:$0xff] %v1416_v27  ;;  %1723 = vst [vmem:[#allocation11_spill] sm:$0xff] %v1418_v59  ;;  %v1421_v56 = vadd.f32 %v350_v52, %v349_v33  ;;  %v396_v39 = vrot.slane %v395_v22, 2  ;;  %v402_v24 = vrot.slane %v401_v21, 2  ;;  %v412_v31 = vrot.slane %v1726_v8, 4 }
  0x5b   :  { %v1424_v3 = vadd.f32 %v356_v55, %v355_v9  ;;  %v379_v45 = vadd.f32 %v378_v42, %v377_v61  ;;  %v418_v5 = vrot.slane %v1728_v12, 4  ;;  %v424_v15 = vrot.slane %v1729_v30, 4  ;;  %v1734_v42 = vld [vmem:[#allocation20_spill] sm:$0xff] }
  0x5c   :  { %1725 = vst [vmem:[#allocation13_spill] sm:$0xff] %v1421_v56  ;;  %v1428_v40 = vadd.f32 %v362_v17, %v361_v18  ;;  %v385_v46 = vadd.f32 %v384_v10, %v383_v50  ;;  %v430_v54 = vrot.slane %v1731_v14, 4  ;;  %v436_v59 = vrot.slane %v1732_v48, 4 }
  0x5d   :  { %1727 = vst [vmem:[#allocation14_spill] sm:$0xff] %v1424_v3  ;;  %v1432_v52 = vadd.f32 %v368_v11, %v367_v36  ;;  %v374_v33 = vrot.slane %v373_v63, 1  ;;  %v391_v56 = vadd.f32 %v390_v47, %v389_v16  ;;  %v407_v27 = vadd.f32 %v406_v38, %v1724_v35  ;;  %v1735_v11 = vld [vmem:[#allocation21_spill] sm:$0xff]  ;;  %v1737_v38 = vld [vmem:[#allocation22_spill] sm:$0xff] }
  0x5e   :  { %1730 = vst [vmem:[#allocation15_spill] sm:$0xff] %v1428_v40  ;;  %v397_v9 = vadd.f32 %v396_v39, %v395_v22  ;;  %v403_v55 = vadd.f32 %v402_v24, %v401_v21  ;;  %v413_v61 = vadd.f32 %v412_v31, %v1726_v8  ;;  %v442_v3 = vrot.slane %v1734_v42, 4 }
  0x5f   :  { %1733 = vst [vmem:[#allocation16_spill] sm:$0xff] %v1432_v52  ;;  %v380_v44 = vrot.slane %v379_v45, 1  ;;  %v419_v18 = vadd.f32 %v418_v5, %v1728_v12  ;;  %v425_v50 = vadd.f32 %v424_v15, %v1729_v30  ;;  %v448_v17 = vrot.slane %v1261_v6, 4 }
  0x60   :  { %v386_v10 = vrot.slane %v385_v46, 1  ;;  %v431_v36 = vadd.f32 %v430_v54, %v1731_v14  ;;  %v437_v16 = vadd.f32 %v436_v59, %v1732_v48  ;;  %v454_v47 = vrot.slane %v1735_v11, 4 }
  0x61   :  { %v1443_v22 = vadd.f32 %v374_v33, %v373_v63  ;;  %v392_v21 = vrot.slane %v391_v56, 1  ;;  %v408_v35 = vrot.slane %v407_v27, 2  ;;  %v460_v39 = vrot.slane %v1737_v38, 4 }
  0x62   :  { %v398_v24 = vrot.slane %v397_v9, 1  ;;  %v404_v8 = vrot.slane %v403_v55, 1  ;;  %v414_v31 = vrot.slane %v413_v61, 2  ;;  %v443_v12 = vadd.f32 %v442_v3, %v1734_v42 }
  0x63   :  { %1736 = vst [vmem:[#allocation17_spill] sm:$0xff] %v1443_v22  ;;  %v1447_v5 = vadd.f32 %v380_v44, %v379_v45  ;;  %v420_v30 = vrot.slane %v419_v18, 2  ;;  %v426_v15 = vrot.slane %v425_v50, 2  ;;  %v449_v14 = vadd.f32 %v448_v17, %v1261_v6 }
  0x64   :  { %v1450_v59 = vadd.f32 %v386_v10, %v385_v46  ;;  %v432_v54 = vrot.slane %v431_v36, 2  ;;  %v438_v63 = vrot.slane %v437_v16, 2  ;;  %v455_v48 = vadd.f32 %v454_v47, %v1735_v11 }
  0x65   :  { %v1453_v33 = vadd.f32 %v392_v21, %v391_v56  ;;  %v409_v22 = vadd.f32 %v408_v35, %v407_v27  ;;  %v461_v52 = vadd.f32 %v460_v39, %v1737_v38  ;;  %v466_v40 = vrot.slane %v1268_v49, 4 }
  0x66   :  { %1738 = vst [vmem:[#allocation18_spill] sm:$0xff] %v1450_v59  ;;  %v1457_v3 = vadd.f32 %v398_v24, %v397_v9  ;;  %v1459_v44 = vadd.f32 %v404_v8, %v403_v55  ;;  %v415_v45 = vadd.f32 %v414_v31, %v413_v61  ;;  %v444_v42 = vrot.slane %v443_v12, 2  ;;  %v1741_v61 = vld [vmem:[#allocation23_spill] sm:$0xff] }
  0x67   :  { %v421_v6 = vadd.f32 %v420_v30, %v419_v18  ;;  %v427_v46 = vadd.f32 %v426_v15, %v425_v50  ;;  %v450_v17 = vrot.slane %v449_v14, 2  ;;  %v472_v10 = vrot.slane %v1270_v1, 4  ;;  %v1742_v18 = vld [vmem:[#allocation24_spill] sm:$0xff] }
  0x68   :  { %1739 = vst [vmem:[#allocation19_spill] sm:$0xff] %v1457_v3  ;;  %1740 = vst [vmem:[#allocation20_spill] sm:$0xff] %v1459_v44  ;;  %v433_v59 = vadd.f32 %v432_v54, %v431_v36  ;;  %v439_v11 = vadd.f32 %v438_v63, %v437_v16  ;;  %v456_v56 = vrot.slane %v455_v48, 2  ;;  %v478_v27 = vrot.slane %v1273_v7, 4 }
  0x69   :  { %v410_v47 = vrot.slane %v409_v22, 1  ;;  %v462_v21 = vrot.slane %v461_v52, 2  ;;  %v467_v35 = vadd.f32 %v466_v40, %v1268_v49  ;;  %v484_v9 = vrot.slane %v1276_v20, 4 }
  0x6a   :  { %v416_v55 = vrot.slane %v415_v45, 1  ;;  %v445_v38 = vadd.f32 %v444_v42, %v443_v12  ;;  %v490_v39 = vrot.slane %v1741_v61, 4  ;;  %v496_v50 = vrot.slane %v1742_v18, 4 }
  0x6b   :  { %v422_v24 = vrot.slane %v421_v6, 1  ;;  %v428_v8 = vrot.slane %v427_v46, 1  ;;  %v451_v31 = vadd.f32 %v450_v17, %v449_v14  ;;  %v473_v36 = vadd.f32 %v472_v10, %v1270_v1 }
  0x6c   :  { %v434_v16 = vrot.slane %v433_v59, 1  ;;  %v440_v30 = vrot.slane %v439_v11, 1  ;;  %v457_v15 = vadd.f32 %v456_v56, %v455_v48  ;;  %v479_v54 = vadd.f32 %v478_v27, %v1273_v7 }
  0x6d   :  { %v1469_v63 = vadd.f32 %v410_v47, %v409_v22  ;;  %v463_v49 = vadd.f32 %v462_v21, %v461_v52  ;;  %v468_v40 = vrot.slane %v467_v35, 2  ;;  %v485_v12 = vadd.f32 %v484_v9, %v1276_v20  ;;  %v1746_v47 = vld [vmem:[#allocation25_spill] sm:$0xff] }
  0x6e   :  { %v1472_v42 = vadd.f32 %v416_v55, %v415_v45  ;;  %v446_v44 = vrot.slane %v445_v38, 1  ;;  %v491_v3 = vadd.f32 %v490_v39, %v1741_v61  ;;  %v497_v14 = vadd.f32 %v496_v50, %v1742_v18  ;;  %v1748_v61 = vld [vmem:[#allocation26_spill] sm:$0xff] }
  0x6f   :  { %v1476_v17 = vadd.f32 %v422_v24, %v421_v6  ;;  %v1478_v1 = vadd.f32 %v428_v8, %v427_v46  ;;  %v452_v48 = vrot.slane %v451_v31, 1  ;;  %v474_v10 = vrot.slane %v473_v36, 2 }
  0x70   :  { %v1480_v7 = vadd.f32 %v434_v16, %v433_v59  ;;  %v1482_v22 = vadd.f32 %v440_v30, %v439_v11  ;;  %v458_v52 = vrot.slane %v457_v15, 1  ;;  %v480_v56 = vrot.slane %v479_v54, 2  ;;  %v1750_v59 = vld [vmem:[#allocation27_spill] sm:$0xff]  ;;  %v1751_v11 = vld [vmem:[#allocation28_spill] sm:$0xff] }
  0x71   :  { %1743 = vst [vmem:[#allocation21_spill] sm:$0xff] %v1478_v1  ;;  %v464_v20 = vrot.slane %v463_v49, 1  ;;  %v469_v45 = vadd.f32 %v468_v40, %v467_v35  ;;  %v486_v27 = vrot.slane %v485_v12, 2  ;;  %v502_v21 = vrot.slane %v1746_v47, 4  ;;  %v1753_v35 = vld [vmem:[#allocation29_spill] sm:$0xff]  ;;  %v1754_v40 = vld [vmem:[#allocation30_spill] sm:$0xff] }
  0x72   :  { %1744 = vst [vmem:[#allocation22_spill] sm:$0xff] %v1480_v7  ;;  %1745 = vst [vmem:[#allocation23_spill] sm:$0xff] %v1482_v22  ;;  %v1485_v9 = vadd.f32 %v446_v44, %v445_v38  ;;  %v492_v55 = vrot.slane %v491_v3, 2  ;;  %v498_v6 = vrot.slane %v497_v14, 2  ;;  %v508_v46 = vrot.slane %v1748_v61, 4 }
  0x73   :  { %v1488_v39 = vadd.f32 %v452_v48, %v451_v31  ;;  %v475_v18 = vadd.f32 %v474_v10, %v473_v36  ;;  %v514_v50 = vrot.slane %v1750_v59, 4  ;;  %v520_v24 = vrot.slane %v1751_v11, 4  ;;  %v1755_v10 = vld [vmem:[#allocation8_spill] sm:$0xff] }
  0x74   :  { %1747 = vst [vmem:[#allocation24_spill] sm:$0xff] %v1485_v9  ;;  %v1492_v8 = vadd.f32 %v458_v52, %v457_v15  ;;  %v481_v16 = vadd.f32 %v480_v56, %v479_v54  ;;  %v526_v30 = vrot.slane %v1753_v35, 4  ;;  %v532_v22 = vrot.slane %v1754_v40, 4  ;;  %v1756_v52 = vld [vmem:[#allocation12_spill] sm:$0xff] }
  0x75   :  { %1749 = vst [vmem:[#allocation25_spill] sm:$0xff] %v1488_v39  ;;  %v1496_v44 = vadd.f32 %v464_v20, %v463_v49  ;;  %v470_v38 = vrot.slane %v469_v45, 1  ;;  %v487_v9 = vadd.f32 %v486_v27, %v485_v12  ;;  %v503_v7 = vadd.f32 %v502_v21, %v1746_v47 }
  0x76   :  { %1752 = vst [vmem:[#allocation26_spill] sm:$0xff] %v1492_v8  ;;  %v493_v31 = vadd.f32 %v492_v55, %v491_v3  ;;  %v499_v48 = vadd.f32 %v498_v6, %v497_v14  ;;  %v509_v36 = vadd.f32 %v508_v46, %v1748_v61  ;;  %v538_v39 = vmax.f32 %v1755_v10, 1e-24  ;;  %v1757_v6 = vld [vmem:[#allocation31_spill] sm:$0xff] }
  0x77   :  { %v476_v1 = vrot.slane %v475_v18, 1  ;;  %v515_v15 = vadd.f32 %v514_v50, %v1750_v59  ;;  %v521_v54 = vadd.f32 %v520_v24, %v1751_v11  ;;  %v539_v56 = vmax.f32 %v1756_v52, 1e-24  ;;  %v1758_v24 = vld [vmem:[#allocation32_spill] sm:$0xff] }
  0x78   :  { %v482_v8 = vrot.slane %v481_v16, 1  ;;  %v527_v49 = vadd.f32 %v526_v30, %v1753_v35  ;;  %v533_v12 = vadd.f32 %v532_v22, %v1754_v40  ;;  %v540_v20 = vmax.f32 %v1300_v34, 1e-24 }
  0x79   :  { %v1507_v3 = vadd.f32 %v470_v38, %v469_v45  ;;  %v488_v14 = vrot.slane %v487_v9, 1  ;;  %v504_v27 = vrot.slane %v503_v7, 2  ;;  %v541_v47 = vmax.f32 %v1304_v19, 1e-24 }
  0x7a   :  { %v494_v21 = vrot.slane %v493_v31, 1  ;;  %v510_v55 = vrot.slane %v509_v36, 2  ;;  %v542_v61 = vmax.f32 %v1757_v6, 1e-24  ;;  %887 = vrsqrt.f32 %v538_v39 }
  0x7b   :  { %v516_v46 = vrot.slane %v515_v15, 2  ;;  %v522_v59 = vrot.slane %v521_v54, 2  ;;  %v543_v50 = vmax.f32 %v1319_v43, 1e-24  ;;  %889 = vrsqrt.f32 %v539_v56 }
  0x7c   :  { %v528_v11 = vrot.slane %v527_v49, 2  ;;  %v534_v22 = vrot.slane %v533_v12, 2  ;;  %v544_v34 = vmax.f32 %v1758_v24, 1e-24  ;;  %891 = vrsqrt.f32 %v540_v20  ;;  %v1761_v24 = vld [vmem:[#allocation35_spill] sm:$0xff] }
  0x7d   :  { %v1513_v45 = vadd.f32 %v476_v1, %v475_v18  ;;  %v500_v35 = vrot.slane %v499_v48, 1  ;;  %v545_v19 = vmax.f32 %v1325_v57, 1e-24  ;;  %893 = vrsqrt.f32 %v541_v47 }
  0x7e   :  { %v505_v30 = vadd.f32 %v504_v27, %v503_v7  ;;  %v511_v40 = vadd.f32 %v510_v55, %v509_v36  ;;  %v546_v39 = vmax.f32 %v1329_v53, 1e-24  ;;  %895 = vrsqrt.f32 %v542_v61 }
  0x7f   :  { %v517_v38 = vadd.f32 %v516_v46, %v515_v15  ;;  %v523_v10 = vadd.f32 %v522_v59, %v521_v54  ;;  %v547_v43 = vmax.f32 %v1331_v32, 1e-24  ;;  %897 = vrsqrt.f32 %v543_v50 }
  0x80   :  { %v529_v52 = vadd.f32 %v528_v11, %v527_v49  ;;  %v535_v56 = vadd.f32 %v534_v22, %v533_v12  ;;  %v548_v20 = vmax.f32 %v1341_v51, 1e-24  ;;  %899 = vrsqrt.f32 %v544_v34  ;;  %v1760_v11 = vld [vmem:[#allocation34_spill] sm:$0xff] }
  0x81   :  { %v1519_v1 = vadd.f32 %v482_v8, %v481_v16  ;;  %v1521_v18 = vadd.f32 %v488_v14, %v487_v9  ;;  %v549_v57 = vmax.f32 %v1344_v58, 1e-24  ;;  %901 = vrsqrt.f32 %v545_v19 }
  0x82   :  { %v506_v7 = vrot.slane %v505_v30, 1  ;;  %v512_v53 = vrot.slane %v511_v40, 1  ;;  %v550_v36 = vmax.f32 %v1348_v13, 1e-24  ;;  %903 = vrsqrt.f32 %v546_v39  ;;  %v1762_v39 = vld [vmem:[#allocation36_spill] sm:$0xff] }
  0x83   :  { %v518_v15 = vrot.slane %v517_v38, 1  ;;  %v524_v32 = vrot.slane %v523_v10, 1  ;;  %v551_v54 = vmax.f32 %v1350_v62, 1e-24  ;;  %905 = vrsqrt.f32 %v547_v43 }
  0x84   :  { %v530_v49 = vrot.slane %v529_v52, 1  ;;  %v536_v51 = vrot.slane %v535_v56, 1  ;;  %v552_v8 = vmax.f32 %v1352_v2, 1e-24  ;;  %907 = vrsqrt.f32 %v548_v20 }
  0x85   :  { %v1527_v9 = vadd.f32 %v494_v21, %v493_v31  ;;  %v1529_v16 = vadd.f32 %v500_v35, %v499_v48  ;;  %v553_v58 = vmax.f32 %v1354_v28, 1e-24  ;;  %909 = vrsqrt.f32 %v549_v57  ;;  %v1015_v35 = vld [vmem:[#allocation2] sm:$0xff]  ;;  %v1020_v57 = vld [vmem:[#allocation2 + $0x28] sm:$0xff] }
  0x86   :  { %v1532_v12 = vadd.f32 %v506_v7, %v505_v30  ;;  %v1534_v13 = vadd.f32 %v512_v53, %v511_v40  ;;  %v554_v14 = vmax.f32 %v1357_v4, 1e-24  ;;  %911 = vrsqrt.f32 %v550_v36 }
  0x87   :  { %v888_v62 = vpop.eup %887  ;;  %v1537_v27 = vadd.f32 %v518_v15, %v517_v38  ;;  %v1539_v47 = vadd.f32 %v524_v32, %v523_v10  ;;  %v555_v2 = vmax.f32 %v1360_v60, 1e-24  ;;  %913 = vrsqrt.f32 %v551_v54  ;;  %v1759_v60 = vld [vmem:[#allocation33_spill] sm:$0xff]  ;;  %v1018_v10 = vld [vmem:[#allocation2 + $0x18] sm:$0xff]  ;;  %v1021_v32 = vld [vmem:[#allocation2 + $0x30] sm:$0xff] }
  0x88   :  { %v890_v31 = vpop.eup %889  ;;  %v1542_v48 = vadd.f32 %v530_v49, %v529_v52  ;;  %v1544_v28 = vadd.f32 %v536_v51, %v535_v56  ;;  %v556_v21 = vmax.f32 %v1364_v25, 1e-24  ;;  %915 = vrsqrt.f32 %v552_v8  ;;  %v1019_v52 = vld [vmem:[#allocation2 + $0x20] sm:$0xff] }
  0x89   :  { %v892_v55 = vpop.eup %891  ;;  %v557_v4 = vmax.f32 %v1368_v41, 1e-24  ;;  %v558_v6 = vmax.f32 %v1379_v0, 1e-24  ;;  %v559_v61 = vmax.f32 %v1383_v37, 1e-24  ;;  %917 = vrsqrt.f32 %v553_v58 }
  0x8a   :  { %v894_v46 = vpop.eup %893  ;;  %v560_v50 = vmax.f32 %v1759_v60, 1e-24  ;;  %v561_v22 = vmax.f32 %v1760_v11, 1e-24  ;;  %v562_v34 = vmax.f32 %v1761_v24, 1e-24  ;;  %919 = vrsqrt.f32 %v554_v14 }
  0x8b   :  { %v1550_v59 = vpop.permute.xlu0 %733  ;;  %v896_v25 = vpop.eup %895  ;;  %921 = vrsqrt.f32 %v555_v2  ;;  %v666_v19 = vmul.f32 %v1015_v35, %v888_v62  ;;  %v1016_v41 = vld [vmem:[#allocation2 + $0x8] sm:$0xff]  ;;  %v1017_v0 = vld [vmem:[#allocation2 + $0x10] sm:$0xff]  ;;  %v563_v38 = vmax.f32 %v1762_v39, 1e-24  ;;  %v669_v43 = vmul.f32 %v1018_v10, %v894_v46  ;;  %v1022_v58 = vld [vmem:[#allocation2 + $0x38] sm:$0xff] }
  0x8c   :  { %v667_v30 = vmul.f32 %v1016_v41, %v890_v31  ;;  %v668_v40 = vmul.f32 %v1017_v0, %v892_v55  ;;  %v898_v37 = vpop.eup %897  ;;  %923 = vrsqrt.f32 %v556_v21  ;;  %v670_v56 = vmul.f32 %v1019_v52, %v896_v25  ;;  %v1023_v55 = vld [vmem:[#allocation2 + $0x40] sm:$0xff]  ;;  %v1024_v60 = vld [vmem:[#allocation2 + $0x48] sm:$0xff]  ;;  %v1764_v39 = vld [vmem:[#allocation10_spill] sm:$0xff] }
  0x8d   :  { %v900_v20 = vpop.eup %899  ;;  %925 = vrsqrt.f32 %v557_v4  ;;  %v671_v7 = vmul.f32 %v1020_v57, %v898_v37  ;;  %v736_v53 = vmul.f32 %v1550_v59, %v666_v19  ;;  %v739_v51 = vmul.f32 %v1550_v59, %v669_v43  ;;  %v1028_v57 = vld [vmem:[#allocation2 + $0x68] sm:$0xff] }
  0x8e   :  { %v737_v36 = vmul.f32 %v1550_v59, %v667_v30  ;;  %v902_v15 = vpop.eup %901  ;;  %927 = vrsqrt.f32 %v558_v6  ;;  %v672_v54 = vmul.f32 %v1021_v32, %v900_v20  ;;  %v738_v49 = vmul.f32 %v1550_v59, %v668_v40  ;;  %v1763_v30 = vld [vmem:[#allocation9_spill] sm:$0xff]  ;;  %v1029_v32 = vld [vmem:[#allocation2 + $0x70] sm:$0xff] }
  0x8f   :  { %v904_v8 = vpop.eup %903  ;;  %929 = vrsqrt.f32 %v559_v61  ;;  %v673_v14 = vmul.f32 %v1022_v58, %v902_v15  ;;  %v740_v62 = vmul.f32 %v1550_v59, %v670_v56  ;;  %v741_v2 = vmul.f32 %v1550_v59, %v671_v7  ;;  %800 = vst [vmem:[#allocation5] sm:$0xff] %v736_v53  ;;  %803 = vst [vmem:[#allocation5 + $0x18] sm:$0xff] %v739_v51  ;;  %v1765_v56 = vld [vmem:[#allocation11_spill] sm:$0xff] }
  0x90   :  { %801 = vst [vmem:[#allocation5 + $0x8] sm:$0xff] %v737_v36  ;;  %v906_v31 = vpop.eup %905  ;;  %v564_v21 = vmax.f32 %v1405_v23, 1e-24  ;;  %931 = vrsqrt.f32 %v560_v50  ;;  %v674_v4 = vmul.f32 %v1023_v55, %v904_v8  ;;  %v742_v6 = vmul.f32 %v1550_v59, %v672_v54  ;;  %802 = vst [vmem:[#allocation5 + $0x10] sm:$0xff] %v738_v49  ;;  %v1025_v50 = vld [vmem:[#allocation2 + $0x50] sm:$0xff]  ;;  %v1766_v36 = vld [vmem:[#allocation13_spill] sm:$0xff] }
  0x91   :  { %v908_v46 = vpop.eup %907  ;;  %v565_v61 = vmax.f32 %v1408_v26, 1e-24  ;;  %933 = vrsqrt.f32 %v561_v22  ;;  %v675_v11 = vmul.f32 %v1024_v60, %v906_v31  ;;  %v743_v24 = vmul.f32 %v1550_v59, %v673_v14  ;;  %804 = vst [vmem:[#allocation5 + $0x20] sm:$0xff] %v740_v62  ;;  %805 = vst [vmem:[#allocation5 + $0x28] sm:$0xff] %v741_v2  ;;  %v1026_v26 = vld [vmem:[#allocation2 + $0x58] sm:$0xff]  ;;  %v1767_v8 = vld [vmem:[#allocation14_spill] sm:$0xff] }
  0x92   :  { %v910_v25 = vpop.eup %909  ;;  %v566_v23 = vmax.f32 %v1412_v29, 1e-24  ;;  %935 = vrsqrt.f32 %v562_v34  ;;  %v676_v35 = vmul.f32 %v1025_v50, %v908_v46  ;;  %v744_v19 = vmul.f32 %v1550_v59, %v674_v4  ;;  %806 = vst [vmem:[#allocation5 + $0x30] sm:$0xff] %v742_v6  ;;  %v1027_v29 = vld [vmem:[#allocation2 + $0x60] sm:$0xff]  ;;  %v1030_v14 = vld [vmem:[#allocation2 + $0x78] sm:$0xff] }
  0x93   :  { %v912_v41 = vpop.eup %911  ;;  %v567_v0 = vmax.f32 %v1763_v30, 1e-24  ;;  %937 = vrsqrt.f32 %v563_v38  ;;  %v677_v22 = vmul.f32 %v1026_v26, %v910_v25  ;;  %v745_v40 = vmul.f32 %v1550_v59, %v675_v11  ;;  %807 = vst [vmem:[#allocation5 + $0x38] sm:$0xff] %v743_v24  ;;  %v1031_v4 = vld [vmem:[#allocation2 + $0x80] sm:$0xff]  ;;  %v1032_v24 = vld [vmem:[#allocation2 + $0x88] sm:$0xff] }
  0x94   :  { %v914_v37 = vpop.eup %913  ;;  %v568_v10 = vmax.f32 %v1764_v39, 1e-24  ;;  %939 = vrsqrt.f32 %v564_v21  ;;  %v678_v34 = vmul.f32 %v1027_v29, %v912_v41  ;;  %v746_v43 = vmul.f32 %v1550_v59, %v676_v35  ;;  %808 = vst [vmem:[#allocation5 + $0x40] sm:$0xff] %v744_v19  ;;  %v1768_v21 = vld [vmem:[#allocation15_spill] sm:$0xff]  ;;  %v1769_v60 = vld [vmem:[#allocation16_spill] sm:$0xff]  ;;  %v1770_v35 = vld [vmem:[#allocation17_spill] sm:$0xff] }
  0x95   :  { %v916_v52 = vpop.eup %915  ;;  %v569_v20 = vmax.f32 %v1765_v56, 1e-24  ;;  %941 = vrsqrt.f32 %v565_v61  ;;  %v679_v38 = vmul.f32 %v1028_v57, %v914_v37  ;;  %v747_v7 = vmul.f32 %v1550_v59, %v677_v22  ;;  %809 = vst [vmem:[#allocation5 + $0x48] sm:$0xff] %v745_v40  ;;  %v1033_v41 = vld [vmem:[#allocation2 + $0x90] sm:$0xff]  ;;  %v1034_v40 = vld [vmem:[#allocation2 + $0x98] sm:$0xff] }
  0x96   :  { %v918_v53 = vpop.eup %917  ;;  %v570_v15 = vmax.f32 %v1766_v36, 1e-24  ;;  %943 = vrsqrt.f32 %v566_v23  ;;  %v680_v54 = vmul.f32 %v1029_v32, %v916_v52  ;;  %v748_v49 = vmul.f32 %v1550_v59, %v678_v34  ;;  %810 = vst [vmem:[#allocation5 + $0x50] sm:$0xff] %v746_v43  ;;  %v1771_v29 = vld [vmem:[#allocation18_spill] sm:$0xff]  ;;  %v1035_v43 = vld [vmem:[#allocation2 + $0xa0] sm:$0xff]  ;;  %v1772_v36 = vld [vmem:[#allocation19_spill] sm:$0xff] }
  0x97   :  { %v920_v51 = vpop.eup %919  ;;  %v571_v58 = vmax.f32 %v1767_v8, 1e-24  ;;  %945 = vrsqrt.f32 %v567_v0  ;;  %v681_v62 = vmul.f32 %v1030_v14, %v918_v53  ;;  %v749_v2 = vmul.f32 %v1550_v59, %v679_v38  ;;  %811 = vst [vmem:[#allocation5 + $0x58] sm:$0xff] %v747_v7  ;;  %v1037_v32 = vld [vmem:[#allocation2 + $0xb0] sm:$0xff]  ;;  %v1773_v8 = vld [vmem:[#allocation20_spill] sm:$0xff] }
  0x98   :  { %v922_v31 = vpop.eup %921  ;;  %v572_v55 = vmax.f32 %v1768_v21, 1e-24  ;;  %947 = vrsqrt.f32 %v568_v10  ;;  %v682_v6 = vmul.f32 %v1031_v4, %v920_v51  ;;  %v750_v46 = vmul.f32 %v1550_v59, %v680_v54  ;;  %812 = vst [vmem:[#allocation5 + $0x60] sm:$0xff] %v748_v49  ;;  %v1039_v21 = vld [vmem:[#allocation2 + $0xc0] sm:$0xff] }
  0x99   :  { %v924_v61 = vpop.eup %923  ;;  %v573_v11 = vmax.f32 %v1769_v60, 1e-24  ;;  %949 = vrsqrt.f32 %v569_v20  ;;  %v683_v25 = vmul.f32 %v1032_v24, %v922_v31  ;;  %v751_v23 = vmul.f32 %v1550_v59, %v681_v62  ;;  %813 = vst [vmem:[#allocation5 + $0x68] sm:$0xff] %v749_v2 }
  0x9a   :  { %v926_v50 = vpop.eup %925  ;;  %v574_v19 = vmax.f32 %v1770_v35, 1e-24  ;;  %951 = vrsqrt.f32 %v570_v15  ;;  %v684_v30 = vmul.f32 %v1033_v41, %v924_v61  ;;  %v752_v0 = vmul.f32 %v1550_v59, %v682_v6  ;;  %814 = vst [vmem:[#allocation5 + $0x70] sm:$0xff] %v750_v46  ;;  %v1040_v61 = vld [vmem:[#allocation2 + $0xc8] sm:$0xff] }
  0x9b   :  { %v928_v26 = vpop.eup %927  ;;  %v575_v22 = vmax.f32 %v1447_v5, 1e-24  ;;  %953 = vrsqrt.f32 %v571_v58  ;;  %v685_v37 = vmul.f32 %v1034_v40, %v926_v50  ;;  %v753_v39 = vmul.f32 %v1550_v59, %v683_v25  ;;  %815 = vst [vmem:[#allocation5 + $0x78] sm:$0xff] %v751_v23  ;;  %v1036_v5 = vld [vmem:[#allocation2 + $0xa8] sm:$0xff] }
  0x9c   :  { %v930_v10 = vpop.eup %929  ;;  %v576_v34 = vmax.f32 %v1771_v29, 1e-24  ;;  %955 = vrsqrt.f32 %v572_v55  ;;  %v686_v52 = vmul.f32 %v1035_v43, %v928_v26  ;;  %v754_v56 = vmul.f32 %v1550_v59, %v684_v30  ;;  %816 = vst [vmem:[#allocation5 + $0x80] sm:$0xff] %v752_v0  ;;  %v1776_v29 = vld [vmem:[#allocation23_spill] sm:$0xff]  ;;  %v1044_v43 = vld [vmem:[#allocation2 + $0xe8] sm:$0xff] }
  0x9d   :  { %v932_v20 = vpop.eup %931  ;;  %v577_v57 = vmax.f32 %v1453_v33, 1e-24  ;;  %957 = vrsqrt.f32 %v573_v11  ;;  %v687_v38 = vmul.f32 %v1036_v5, %v930_v10  ;;  %v755_v7 = vmul.f32 %v1550_v59, %v685_v37  ;;  %817 = vst [vmem:[#allocation5 + $0x88] sm:$0xff] %v753_v39  ;;  %v1038_v33 = vld [vmem:[#allocation2 + $0xb8] sm:$0xff] }
  0x9e   :  { %v934_v53 = vpop.eup %933  ;;  %v578_v15 = vmax.f32 %v1772_v36, 1e-24  ;;  %959 = vrsqrt.f32 %v574_v19  ;;  %v688_v54 = vmul.f32 %v1037_v32, %v932_v20  ;;  %v756_v49 = vmul.f32 %v1550_v59, %v686_v52  ;;  %818 = vst [vmem:[#allocation5 + $0x90] sm:$0xff] %v754_v56  ;;  %v1774_v19 = vld [vmem:[#allocation21_spill] sm:$0xff] }
  0x9f   :  { %v936_v51 = vpop.eup %935  ;;  %v579_v58 = vmax.f32 %v1773_v8, 1e-24  ;;  %961 = vrsqrt.f32 %v575_v22  ;;  %v689_v14 = vmul.f32 %v1038_v33, %v934_v53  ;;  %v757_v62 = vmul.f32 %v1550_v59, %v687_v38  ;;  %819 = vst [vmem:[#allocation5 + $0x98] sm:$0xff] %v755_v7  ;;  %v1775_v22 = vld [vmem:[#allocation22_spill] sm:$0xff] }
  0xa0   :  { %v938_v2 = vpop.eup %937  ;;  %v580_v31 = vmax.f32 %v1469_v63, 1e-24  ;;  %963 = vrsqrt.f32 %v576_v34  ;;  %v690_v55 = vmul.f32 %v1039_v21, %v936_v51  ;;  %v758_v4 = vmul.f32 %v1550_v59, %v688_v54  ;;  %820 = vst [vmem:[#allocation5 + $0xa0] sm:$0xff] %v756_v49  ;;  %v1041_v63 = vld [vmem:[#allocation2 + $0xd0] sm:$0xff]  ;;  %v1046_v54 = vld [vmem:[#allocation2 + $0xf8] sm:$0xff] }
  0xa1   :  { %v940_v6 = vpop.eup %939  ;;  %v581_v46 = vmax.f32 %v1472_v42, 1e-24  ;;  %965 = vrsqrt.f32 %v577_v57  ;;  %v691_v60 = vmul.f32 %v1040_v61, %v938_v2  ;;  %v759_v11 = vmul.f32 %v1550_v59, %v689_v14  ;;  %821 = vst [vmem:[#allocation5 + $0xa8] sm:$0xff] %v757_v62  ;;  %v1042_v42 = vld [vmem:[#allocation2 + $0xd8] sm:$0xff]  ;;  %v1777_v57 = vld [vmem:[#allocation24_spill] sm:$0xff]  ;;  %v1045_v38 = vld [vmem:[#allocation2 + $0xf0] sm:$0xff] }
  0xa2   :  { %v942_v24 = vpop.eup %941  ;;  %v582_v25 = vmax.f32 %v1476_v17, 1e-24  ;;  %967 = vrsqrt.f32 %v578_v15  ;;  %v692_v23 = vmul.f32 %v1041_v63, %v940_v6  ;;  %v760_v50 = vmul.f32 %v1550_v59, %v690_v55  ;;  %822 = vst [vmem:[#allocation5 + $0xb0] sm:$0xff] %v758_v4  ;;  %v1043_v17 = vld [vmem:[#allocation2 + $0xe0] sm:$0xff]  ;;  %v1778_v15 = vld [vmem:[#allocation25_spill] sm:$0xff] }
  0xa3   :  { %v944_v35 = vpop.eup %943  ;;  %v583_v41 = vmax.f32 %v1774_v19, 1e-24  ;;  %969 = vrsqrt.f32 %v579_v58  ;;  %v693_v30 = vmul.f32 %v1042_v42, %v942_v24  ;;  %v761_v0 = vmul.f32 %v1550_v59, %v691_v60  ;;  %823 = vst [vmem:[#allocation5 + $0xb8] sm:$0xff] %v759_v11  ;;  %v1779_v58 = vld [vmem:[#allocation26_spill] sm:$0xff]  ;;  %v1047_v14 = vld [vmem:[#allocation2 + $0x100] sm:$0xff]  ;;  %v1048_v55 = vld [vmem:[#allocation2 + $0x108] sm:$0xff] }
  0xa4   :  { %v946_v26 = vpop.eup %945  ;;  %v584_v40 = vmax.f32 %v1775_v22, 1e-24  ;;  %971 = vrsqrt.f32 %v580_v31  ;;  %v694_v37 = vmul.f32 %v1043_v17, %v944_v35  ;;  %v762_v39 = vmul.f32 %v1550_v59, %v692_v23  ;;  %824 = vst [vmem:[#allocation5 + $0xc0] sm:$0xff] %v760_v50  ;;  %v1049_v60 = vld [vmem:[#allocation2 + $0x110] sm:$0xff] }
  0xa5   :  { %v948_v10 = vpop.eup %947  ;;  %v585_v34 = vmax.f32 %v1776_v29, 1e-24  ;;  %973 = vrsqrt.f32 %v581_v46  ;;  %v695_v52 = vmul.f32 %v1044_v43, %v946_v26  ;;  %v763_v56 = vmul.f32 %v1550_v59, %v693_v30  ;;  %825 = vst [vmem:[#allocation5 + $0xc8] sm:$0xff] %v761_v0 }
  0xa6   :  { %v950_v20 = vpop.eup %949  ;;  %v586_v5 = vmax.f32 %v1777_v57, 1e-24  ;;  %975 = vrsqrt.f32 %v582_v25  ;;  %v696_v7 = vmul.f32 %v1045_v38, %v948_v10  ;;  %v764_v53 = vmul.f32 %v1550_v59, %v694_v37  ;;  %826 = vst [vmem:[#allocation5 + $0xd0] sm:$0xff] %v762_v39 }
  0xa7   :  { %v952_v36 = vpop.eup %951  ;;  %v587_v32 = vmax.f32 %v1778_v15, 1e-24  ;;  %977 = vrsqrt.f32 %v583_v41  ;;  %v697_v49 = vmul.f32 %v1046_v54, %v950_v20  ;;  %v765_v51 = vmul.f32 %v1550_v59, %v695_v52  ;;  %827 = vst [vmem:[#allocation5 + $0xd8] sm:$0xff] %v763_v56 }
  0xa8   :  { %v954_v8 = vpop.eup %953  ;;  %v588_v33 = vmax.f32 %v1779_v58, 1e-24  ;;  %979 = vrsqrt.f32 %v584_v40  ;;  %v698_v62 = vmul.f32 %v1047_v14, %v952_v36  ;;  %v766_v2 = vmul.f32 %v1550_v59, %v696_v7  ;;  %828 = vst [vmem:[#allocation5 + $0xe0] sm:$0xff] %v764_v53 }
  0xa9   :  { %v956_v31 = vpop.eup %955  ;;  %v589_v21 = vmax.f32 %v1496_v44, 1e-24  ;;  %981 = vrsqrt.f32 %v585_v34  ;;  %v699_v4 = vmul.f32 %v1048_v55, %v954_v8  ;;  %v767_v6 = vmul.f32 %v1550_v59, %v697_v49  ;;  %829 = vst [vmem:[#allocation5 + $0xe8] sm:$0xff] %v765_v51  ;;  %v1050_v44 = vld [vmem:[#allocation2 + $0x118] sm:$0xff] }
  0xaa   :  { %v958_v46 = vpop.eup %957  ;;  %v590_v61 = vmax.f32 %v1507_v3, 1e-24  ;;  %983 = vrsqrt.f32 %v586_v5  ;;  %v700_v11 = vmul.f32 %v1049_v60, %v956_v31  ;;  %v768_v24 = vmul.f32 %v1550_v59, %v698_v62  ;;  %830 = vst [vmem:[#allocation5 + $0xf0] sm:$0xff] %v766_v2  ;;  %v1051_v3 = vld [vmem:[#allocation2 + $0x120] sm:$0xff] }
  0xab   :  { %v960_v25 = vpop.eup %959  ;;  %v591_v63 = vmax.f32 %v1513_v45, 1e-24  ;;  %985 = vrsqrt.f32 %v587_v32  ;;  %v701_v23 = vmul.f32 %v1050_v44, %v958_v46  ;;  %v769_v50 = vmul.f32 %v1550_v59, %v699_v4  ;;  %831 = vst [vmem:[#allocation5 + $0xf8] sm:$0xff] %v767_v6  ;;  %v1052_v45 = vld [vmem:[#allocation2 + $0x128] sm:$0xff]  ;;  %v1061_v46 = vld [vmem:[#allocation2 + $0x170] sm:$0xff] }
  0xac   :  { %v962_v35 = vpop.eup %961  ;;  %v592_v19 = vmax.f32 %v1519_v1, 1e-24  ;;  %987 = vrsqrt.f32 %v588_v33  ;;  %v702_v41 = vmul.f32 %v1051_v3, %v960_v25  ;;  %v770_v42 = vmul.f32 %v1550_v59, %v700_v11  ;;  %832 = vst [vmem:[#allocation5 + $0x100] sm:$0xff] %v768_v24  ;;  %v1053_v1 = vld [vmem:[#allocation2 + $0x130] sm:$0xff]  ;;  %v1062_v11 = vld [vmem:[#allocation2 + $0x178] sm:$0xff] }
  0xad   :  { %v964_v30 = vpop.eup %963  ;;  %v593_v0 = vmax.f32 %v1521_v18, 1e-24  ;;  %989 = vrsqrt.f32 %v589_v21  ;;  %v703_v26 = vmul.f32 %v1052_v45, %v962_v35  ;;  %v771_v22 = vmul.f32 %v1550_v59, %v701_v23  ;;  %833 = vst [vmem:[#allocation5 + $0x108] sm:$0xff] %v769_v50  ;;  %v1054_v18 = vld [vmem:[#allocation2 + $0x138] sm:$0xff]  ;;  %v1064_v35 = vld [vmem:[#allocation2 + $0x188] sm:$0xff] }
  0xae   :  { %v966_v40 = vpop.eup %965  ;;  %v594_v17 = vmax.f32 %v1527_v9, 1e-24  ;;  %991 = vrsqrt.f32 %v590_v61  ;;  %v704_v37 = vmul.f32 %v1053_v1, %v964_v30  ;;  %v772_v39 = vmul.f32 %v1550_v59, %v702_v41  ;;  %834 = vst [vmem:[#allocation5 + $0x110] sm:$0xff] %v770_v42  ;;  %v1055_v9 = vld [vmem:[#allocation2 + $0x140] sm:$0xff]  ;;  %v1065_v42 = vld [vmem:[#allocation2 + $0x190] sm:$0xff] }
  0xaf   :  { %v968_v10 = vpop.eup %967  ;;  %v595_v29 = vmax.f32 %v1529_v16, 1e-24  ;;  %993 = vrsqrt.f32 %v591_v63  ;;  %v705_v34 = vmul.f32 %v1054_v18, %v966_v40  ;;  %v773_v43 = vmul.f32 %v1550_v59, %v703_v26  ;;  %835 = vst [vmem:[#allocation5 + $0x118] sm:$0xff] %v771_v22  ;;  %v1056_v16 = vld [vmem:[#allocation2 + $0x148] sm:$0xff]  ;;  %v1063_v63 = vld [vmem:[#allocation2 + $0x180] sm:$0xff]  ;;  %v1066_v26 = vld [vmem:[#allocation2 + $0x198] sm:$0xff] }
  0xb0   :  { %v970_v52 = vpop.eup %969  ;;  %v596_v56 = vmax.f32 %v1532_v12, 1e-24  ;;  %995 = vrsqrt.f32 %v592_v19  ;;  %v706_v20 = vmul.f32 %v1055_v9, %v968_v10  ;;  %v774_v57 = vmul.f32 %v1550_v59, %v704_v37  ;;  %836 = vst [vmem:[#allocation5 + $0x120] sm:$0xff] %v772_v39  ;;  %v1057_v12 = vld [vmem:[#allocation2 + $0x150] sm:$0xff]  ;;  %v1067_v1 = vld [vmem:[#allocation2 + $0x1a0] sm:$0xff] }
  0xb1   :  { %v972_v5 = vpop.eup %971  ;;  %v597_v38 = vmax.f32 %v1534_v13, 1e-24  ;;  %997 = vrsqrt.f32 %v593_v0  ;;  %v707_v7 = vmul.f32 %v1056_v16, %v970_v52  ;;  %v775_v53 = vmul.f32 %v1550_v59, %v705_v34  ;;  %837 = vst [vmem:[#allocation5 + $0x128] sm:$0xff] %v773_v43  ;;  %v1058_v13 = vld [vmem:[#allocation2 + $0x158] sm:$0xff]  ;;  %v1069_v52 = vld [vmem:[#allocation2 + $0x1b0] sm:$0xff] }
  0xb2   :  { %v974_v36 = vpop.eup %973  ;;  %v598_v15 = vmax.f32 %v1537_v27, 1e-24  ;;  %999 = vrsqrt.f32 %v594_v17  ;;  %v708_v32 = vmul.f32 %v1057_v12, %v972_v5  ;;  %v776_v54 = vmul.f32 %v1550_v59, %v706_v20  ;;  %838 = vst [vmem:[#allocation5 + $0x130] sm:$0xff] %v774_v57  ;;  %v1059_v27 = vld [vmem:[#allocation2 + $0x160] sm:$0xff]  ;;  %v1070_v57 = vld [vmem:[#allocation2 + $0x1b8] sm:$0xff]  ;;  %v1072_v12 = vld [vmem:[#allocation2 + $0x1c8] sm:$0xff] }
  0xb3   :  { %v976_v49 = vpop.eup %975  ;;  %v599_v51 = vmax.f32 %v1539_v47, 1e-24  ;;  %1001 = vrsqrt.f32 %v595_v29  ;;  %v709_v8 = vmul.f32 %v1058_v13, %v974_v36  ;;  %v777_v58 = vmul.f32 %v1550_v59, %v707_v7  ;;  %839 = vst [vmem:[#allocation5 + $0x138] sm:$0xff] %v775_v53  ;;  %v1060_v47 = vld [vmem:[#allocation2 + $0x168] sm:$0xff]  ;;  %v1071_v7 = vld [vmem:[#allocation2 + $0x1c0] sm:$0xff] }
  0xb4   :  { %v978_v33 = vpop.eup %977  ;;  %v600_v14 = vmax.f32 %v1542_v48, 1e-24  ;;  %1003 = vrsqrt.f32 %v596_v56  ;;  %v710_v62 = vmul.f32 %v1059_v27, %v976_v49  ;;  %v778_v2 = vmul.f32 %v1550_v59, %v708_v32  ;;  %840 = vst [vmem:[#allocation5 + $0x140] sm:$0xff] %v776_v54  ;;  %v1068_v29 = vld [vmem:[#allocation2 + $0x1a8] sm:$0xff] }
  0xb5   :  { %v980_v31 = vpop.eup %979  ;;  %v601_v21 = vmax.f32 %v1544_v28, 1e-24  ;;  %1005 = vrsqrt.f32 %v597_v38  ;;  %v711_v55 = vmul.f32 %v1060_v47, %v978_v33  ;;  %v779_v4 = vmul.f32 %v1550_v59, %v709_v8  ;;  %841 = vst [vmem:[#allocation5 + $0x148] sm:$0xff] %v777_v58  ;;  %v1074_v33 = vld [vmem:[#allocation2 + $0x1d8] sm:$0xff] }
  0xb6   :  { %v982_v6 = vpop.eup %981  ;;  %1007 = vrsqrt.f32 %v598_v15  ;;  %v712_v61 = vmul.f32 %v1061_v46, %v980_v31  ;;  %v780_v48 = vmul.f32 %v1550_v59, %v710_v62  ;;  %842 = vst [vmem:[#allocation5 + $0x150] sm:$0xff] %v778_v2  ;;  %v1075_v2 = vld [vmem:[#allocation2 + $0x1e0] sm:$0xff] }
  0xb7   :  { %v984_v60 = vpop.eup %983  ;;  %1009 = vrsqrt.f32 %v599_v51  ;;  %v713_v24 = vmul.f32 %v1062_v11, %v982_v6  ;;  %v781_v25 = vmul.f32 %v1550_v59, %v711_v55  ;;  %843 = vst [vmem:[#allocation5 + $0x158] sm:$0xff] %v779_v4  ;;  %v1073_v51 = vld [vmem:[#allocation2 + $0x1d0] sm:$0xff]  ;;  %v1076_v55 = vld [vmem:[#allocation2 + $0x1e8] sm:$0xff]  ;;  %v1078_v11 = vld [vmem:[#allocation2 + $0x1f8] sm:$0xff] }
  0xb8   :  { %v986_v28 = vpop.eup %985  ;;  %1011 = vrsqrt.f32 %v600_v14  ;;  %v714_v44 = vmul.f32 %v1063_v63, %v984_v60  ;;  %v782_v23 = vmul.f32 %v1550_v59, %v712_v61  ;;  %844 = vst [vmem:[#allocation5 + $0x160] sm:$0xff] %v780_v48  ;;  %v1077_v61 = vld [vmem:[#allocation2 + $0x1f0] sm:$0xff] }
  0xb9   :  { %v988_v50 = vpop.eup %987  ;;  %1013 = vrsqrt.f32 %v601_v21  ;;  %v715_v19 = vmul.f32 %v1064_v35, %v986_v28  ;;  %v783_v3 = vmul.f32 %v1550_v59, %v713_v24  ;;  %845 = vst [vmem:[#allocation5 + $0x168] sm:$0xff] %v781_v25 }
  0xba   :  { %v990_v41 = vpop.eup %989  ;;  %v716_v30 = vmul.f32 %v1065_v42, %v988_v50  ;;  %v784_v0 = vmul.f32 %v1550_v59, %v714_v44  ;;  %846 = vst [vmem:[#allocation5 + $0x170] sm:$0xff] %v782_v23 }
  0xbb   :  { %v992_v45 = vpop.eup %991  ;;  %v717_v22 = vmul.f32 %v1066_v26, %v990_v41  ;;  %v785_v40 = vmul.f32 %v1550_v59, %v715_v19  ;;  %847 = vst [vmem:[#allocation5 + $0x178] sm:$0xff] %v783_v3 }
  0xbc   :  { %v994_v17 = vpop.eup %993  ;;  %v718_v37 = vmul.f32 %v1067_v1, %v992_v45  ;;  %v786_v39 = vmul.f32 %v1550_v59, %v716_v30  ;;  %848 = vst [vmem:[#allocation5 + $0x180] sm:$0xff] %v784_v0 }
  0xbd   :  { %v996_v10 = vpop.eup %995  ;;  %v719_v18 = vmul.f32 %v1068_v29, %v994_v17  ;;  %v787_v34 = vmul.f32 %v1550_v59, %v717_v22  ;;  %849 = vst [vmem:[#allocation5 + $0x188] sm:$0xff] %v785_v40 }
  0xbe   :  { %v998_v43 = vpop.eup %997  ;;  %v720_v56 = vmul.f32 %v1069_v52, %v996_v10  ;;  %v788_v9 = vmul.f32 %v1550_v59, %v718_v37  ;;  %850 = vst [vmem:[#allocation5 + $0x190] sm:$0xff] %v786_v39 }
  0xbf   :  { %v1000_v20 = vpop.eup %999  ;;  %v721_v5 = vmul.f32 %v1070_v57, %v998_v43  ;;  %v789_v38 = vmul.f32 %v1550_v59, %v719_v18  ;;  %851 = vst [vmem:[#allocation5 + $0x198] sm:$0xff] %v787_v34 }
  0xc0   :  { %v1002_v16 = vpop.eup %1001  ;;  %v722_v53 = vmul.f32 %v1071_v7, %v1000_v20  ;;  %v790_v36 = vmul.f32 %v1550_v59, %v720_v56  ;;  %852 = vst [vmem:[#allocation5 + $0x1a0] sm:$0xff] %v788_v9 }
  0xc1   :  { %v1004_v15 = vpop.eup %1003  ;;  %v723_v32 = vmul.f32 %v1072_v12, %v1002_v16  ;;  %v791_v54 = vmul.f32 %v1550_v59, %v721_v5  ;;  %853 = vst [vmem:[#allocation5 + $0x1a8] sm:$0xff] %v789_v38 }
  0xc2   :  { %v1006_v49 = vpop.eup %1005  ;;  %v724_v13 = vmul.f32 %v1073_v51, %v1004_v15  ;;  %v792_v8 = vmul.f32 %v1550_v59, %v722_v53  ;;  %854 = vst [vmem:[#allocation5 + $0x1b0] sm:$0xff] %v790_v36 }
  0xc3   :  { %v1008_v58 = vpop.eup %1007  ;;  %v725_v14 = vmul.f32 %v1074_v33, %v1006_v49  ;;  %v793_v27 = vmul.f32 %v1550_v59, %v723_v32  ;;  %855 = vst [vmem:[#allocation5 + $0x1b8] sm:$0xff] %v791_v54 }
  0xc4   :  { %v1010_v62 = vpop.eup %1009  ;;  %v726_v31 = vmul.f32 %v1075_v2, %v1008_v58  ;;  %v794_v21 = vmul.f32 %v1550_v59, %v724_v13  ;;  %856 = vst [vmem:[#allocation5 + $0x1c0] sm:$0xff] %v792_v8 }
  0xc5   :  { %v1012_v47 = vpop.eup %1011  ;;  %v727_v4 = vmul.f32 %v1076_v55, %v1010_v62  ;;  %v795_v6 = vmul.f32 %v1550_v59, %v725_v14  ;;  %857 = vst [vmem:[#allocation5 + $0x1c8] sm:$0xff] %v793_v27 }
  0xc6   :  { %v1014_v46 = vpop.eup %1013  ;;  %v728_v48 = vmul.f32 %v1077_v61, %v1012_v47  ;;  %v796_v60 = vmul.f32 %v1550_v59, %v726_v31  ;;  %858 = vst [vmem:[#allocation5 + $0x1d0] sm:$0xff] %v794_v21 }
  0xc7   :  { %v729_v24 = vmul.f32 %v1078_v11, %v1014_v46  ;;  %v797_v25 = vmul.f32 %v1550_v59, %v727_v4  ;;  %859 = vst [vmem:[#allocation5 + $0x1d8] sm:$0xff] %v795_v6 }
  0xc8   :  { %v798_v28 = vmul.f32 %v1550_v59, %v728_v48  ;;  %860 = vst [vmem:[#allocation5 + $0x1e0] sm:$0xff] %v796_v60 }
  0xc9   :  { %v799_v63 = vmul.f32 %v1550_v59, %v729_v24  ;;  %861 = vst [vmem:[#allocation5 + $0x1e8] sm:$0xff] %v797_v25 }
  0xca   :  { %862 = vst [vmem:[#allocation5 + $0x1f0] sm:$0xff] %v798_v28 }
  0xcb   :  { %863 = vst [vmem:[#allocation5 + $0x1f8] sm:$0xff] %v799_v63 }
  0xcc   :  { %1110 = shalt.err (!%p1107_p9)
}
  0xcd   :  { %875 = dma.vmem_to_hbm [thread:$0]  %s870_s1, 8192, %s1666_s2, [#allocation4], %s1124_s12, %s1124_s12, %s1125_s13  }
  0xce   :  { %1121 = dma.done.wait [#allocation4], 8192  }
  0xcf   :  { %1122 = vsyncadd [#allocation4], 4294959104 }
  0xd0   :  { %879 = vsyncpa [#allocation3], 1 }
  0xd1   :  { %880 = vsyncpa [#allocation4], 1 }

</bundles_post_ra>
